<compile_context>
chip_gen: v7x
topology: tpu7x:2x2x1
jax: 0.10.0
libtpu: 0.0.40
codegen_flags: <defaults>
</compile_context>

<pallas_src>
import functools

import jax
import jax.numpy as jnp
from jax.experimental import pallas as pl
from jax.experimental.pallas import tpu as pltpu

NUM_NODES = 311  # hard-coded in the PyTorch module


# ---------------------------------------------------------------------------
# Fused rollout kernel (factory: depends on steps_behind / MLP depth / act)
# ---------------------------------------------------------------------------
def _make_fused_kernel(steps_behind, n_mid, non_linearity):
    """Build the fused recurrent-rollout kernel for a given MLP structure."""

    def act(x):
        if non_linearity == "relu":
            return jnp.maximum(x, 0.0)
        if non_linearity == "tanh":
            return jnp.tanh(x)
        if non_linearity == "sigmoid":
            return jax.nn.sigmoid(x)
        if non_linearity == "elu":
            return jax.nn.elu(x)
        return x  # identity fallback

    def kernel(*refs):
        # ---- unpack refs (inputs, output, scratch) --------------------------
        runoff_ref, hs_init_ref, ht_init_ref, elev_ref, gl_ref = refs[:5]
        i = 5
        w1h_ref, w1r_ref, b1_ref = refs[i:i + 3]; i += 3
        mid_refs = refs[i:i + 2 * n_mid]; i += 2 * n_mid
        wl_ref, bl_ref = refs[i:i + 2]; i += 2
        rw1_ref, rb1_ref, rw2_ref, rb2_ref = refs[i:i + 4]; i += 4
        pred_ref = refs[i]; i += 1
        hs_scr, ht_scr = refs[i:i + 2]          # persistent VMEM recurrent state

        step = pl.program_id(0)

        @pl.when(step == 0)
        def _init_state():
            hs_scr[...] = hs_init_ref[...]      # (sb, B, NN) head window chunks
            ht_scr[...] = ht_init_ref[...]      # (B, NN)     head at time t

        # ---- "layer" MLP on concat([head_step, runoff_step]) ----------------
        # concat folded into the first matmul: x@W1 = sum_j chunk_j@W1h_j + runoff@W1r
        acc = jnp.dot(runoff_ref[0], w1r_ref[...],
                      preferred_element_type=jnp.float32)
        for j in range(steps_behind):
            acc = acc + jnp.dot(hs_scr[j], w1h_ref[j],
                                preferred_element_type=jnp.float32)
        h = act(acc + b1_ref[...])
        for m in range(n_mid):
            w_ref, b_ref = mid_refs[2 * m], mid_refs[2 * m + 1]
            h = act(jnp.dot(h, w_ref[...],
                            preferred_element_type=jnp.float32) + b_ref[...])
        layer_out = jnp.tanh(
            jnp.dot(h, wl_ref[...], preferred_element_type=jnp.float32)
            + bl_ref[...])

        # ---- "res_layer" MLP on head_time_t ---------------------------------
        r = act(jnp.dot(ht_scr[...], rw1_ref[...],
                        preferred_element_type=jnp.float32) + rb1_ref[...])
        res_out = jnp.tanh(
            jnp.dot(r, rw2_ref[...], preferred_element_type=jnp.float32)
            + rb2_ref[...])

        # ---- residual sum + invert / ground-level clipping -------------------
        new_h = res_out + layer_out
        new_h = jnp.maximum(new_h, elev_ref[...])
        new_h = jnp.minimum(new_h, gl_ref[...])

        # prediction for this step goes straight to HBM output block `step`
        pred_ref[0] = new_h.astype(pred_ref.dtype)

        # ---- _get_new_h0: cat([head_step, new_h])[:, -NN*sb:] ----------------
        # == drop the oldest NN-wide chunk, shift, append new_h as last chunk.
        for j in range(steps_behind - 1):
            hs_scr[j] = hs_scr[j + 1]
        hs_scr[steps_behind - 1] = new_h
        ht_scr[...] = new_h

    return kernel


# ---------------------------------------------------------------------------
# Parameter setup (matches torch.nn.Linear default init range; weights are
# stored transposed as (in_features, out_features))
# ---------------------------------------------------------------------------
def init_mlp(key, input_dim, output_dim, hidden_dim, n_hidden_layers):
    dims = [input_dim] + [hidden_dim] * n_hidden_layers + [output_dim]
    params = []
    for idx, (din, dout) in enumerate(zip(dims[:-1], dims[1:])):
        kw, kb = jax.random.split(jax.random.fold_in(key, idx))
        bound = 1.0 / (din ** 0.5)
        w = jax.random.uniform(kw, (din, dout), jnp.float32, -bound, bound)
        b = jax.random.uniform(kb, (dout,), jnp.float32, -bound, bound)
        params.append((w, b))
    return params


# ---------------------------------------------------------------------------
# Forward pass: one fused pallas_call for the whole recursive rollout
# ---------------------------------------------------------------------------
@functools.partial(
    jax.jit,
    static_argnames=("batch_size", "steps_behind", "length_simulation",
                     "prediction_steps", "non_linearity"))
def mlp_benchmark_forward(params_layer, params_res,
                          norm_h_x, norm_runoff, norm_elevation,
                          norm_ground_level, *, batch_size, steps_behind,
                          length_simulation, prediction_steps=1,
                          non_linearity="relu"):
    assert length_simulation >= prediction_steps, \
        "The prediction is longer than the desired simulation length."
    assert length_simulation % prediction_steps == 0, \
        "The prediction should be a multiple of the simulation length."

    num_nodes = norm_h_x.shape[0]
    B = batch_size
    sb = steps_behind
    ps = prediction_steps
    NN = num_nodes // B
    n_steps = length_simulation // ps
    f32 = jnp.float32

    elevation = norm_elevation.reshape(B, NN).astype(f32)
    ground_level = norm_ground_level.reshape(B, NN).astype(f32)

    head_step = norm_h_x.reshape(B, NN * sb).astype(f32)
    hs_init = head_step.reshape(B, sb, NN).transpose(1, 0, 2)   # (sb, B, NN)
    ht_init = norm_h_x[:, -1].reshape(B, NN).astype(f32)

    # Pre-slice every step's runoff window once: (n_steps, B, NN*(sb+ps)).
    runoff_slabs = jnp.stack(
        [norm_runoff[:, s:s + sb + ps].reshape(B, -1).astype(f32)
         for s in range(0, length_simulation, ps)], axis=0)
    R = runoff_slabs.shape[-1]

    # Split the first "layer" weight: head part (per window chunk) + runoff part,
    # so cat([head_step, runoff_step]) never materializes.
    (w1, b1) = params_layer[0]
    H = w1.shape[1]
    assert w1.shape[0] == NN * sb + R, "layer input_dim mismatch"
    w1h = w1[:NN * sb, :].reshape(sb, NN, H)
    w1r = w1[NN * sb:, :]
    mid = list(params_layer[1:-1])
    w_last, b_last = params_layer[-1]
    (rw1, rb1), (rw2, rb2) = params_res       # res MLP has exactly 2 linears

    args = [runoff_slabs, hs_init, ht_init, elevation, ground_level,
            w1h, w1r, b1.reshape(1, -1)]
    for (w, b) in mid:
        args += [w, b.reshape(1, -1)]
    args += [w_last, b_last.reshape(1, -1),
             rw1, rb1.reshape(1, -1), rw2, rb2.reshape(1, -1)]

    def _const_spec(a):
        nd = a.ndim
        return pl.BlockSpec(tuple(a.shape), lambda t, _nd=nd: (0,) * _nd)

    in_specs = ([pl.BlockSpec((1, B, R), lambda t: (t, 0, 0))]   # per-step runoff
                + [_const_spec(a) for a in args[1:]])            # resident in VMEM
    out_specs = pl.BlockSpec((1, B, NN), lambda t: (t, 0, 0))

    macs = sum(int(w.shape[0]) * int(w.shape[1])
               for (w, _) in list(params_layer) + list(params_res))
    param_bytes = sum((int(w.size) + int(b.size)) * 4
                      for (w, b) in list(params_layer) + list(params_res))
    cost = pl.CostEstimate(
        flops=int(2 * B * macs * n_steps),
        transcendentals=int(2 * B * NN * n_steps),
        bytes_accessed=int(param_bytes
                           + 4 * (int(runoff_slabs.size)
                                  + 2 * n_steps * B * NN
                                  + num_nodes * (sb + 2))),
    )

    kernel = _make_fused_kernel(sb, len(mid), non_linearity)

    pred = pl.pallas_call(
        kernel,
        grid=(n_steps,),
        in_specs=in_specs,
        out_specs=out_specs,
        out_shape=jax.ShapeDtypeStruct((n_steps, B, NN), jnp.float32),
        scratch_shapes=[pltpu.VMEM((sb, B, NN), jnp.float32),   # head window
                        pltpu.VMEM((B, NN), jnp.float32)],      # head at time t
        compiler_params=pltpu.CompilerParams(
            dimension_semantics=("arbitrary",)),
        cost_estimate=cost,
    )(*args)

    # (n_steps, B, NN) -> (num_nodes, length_simulation), matching
    # pred_h_acum[:, step:step+ps] = head_time_t.reshape(-1, 1)
    pred_nodes = pred.reshape(n_steps, num_nodes).T
    if ps > 1:
        pred_nodes = jnp.repeat(pred_nodes, ps, axis=1)
    return pred_nodes


# ---------------------------------------------------------------------------
# Pure-JAX reference (mirrors the PyTorch forward literally) for validation
# ---------------------------------------------------------------------------
def _reference_forward(params_layer, params_res, norm_h_x, norm_runoff,
                       norm_elevation, norm_ground_level, *, batch_size,
                       steps_behind, length_simulation, prediction_steps=1,
                       non_linearity="relu"):
    def act(x):
        return jnp.maximum(x, 0.0) if non_linearity == "relu" else jnp.tanh(x)

    def mlp(params, x):
        n = len(params)
        for i, (w, b) in enumerate(params):
            y = jnp.dot(x, w, precision=jax.lax.Precision.HIGHEST) + b
            x = jnp.tanh(y) if i == n - 1 else act(y)
        return x

    num_nodes = norm_h_x.shape[0]
    B = batch_size
    elevation = norm_elevation.reshape(B, -1)
    ground_level = norm_ground_level.reshape(B, -1)
    head_step = norm_h_x.reshape(B, -1)
    head_time_t = norm_h_x[:, -1].reshape(B, -1)
    cols = []
    for step in range(0, length_simulation, prediction_steps):
        runoff_step = norm_runoff[:, step:step + steps_behind + prediction_steps]
        runoff_step = runoff_step.reshape(B, -1)
        har = jnp.concatenate([head_step, runoff_step], axis=1)
        head_time_t = mlp(params_res, head_time_t) + mlp(params_layer, har)
        head_time_t = jnp.maximum(head_time_t, elevation)
        head_time_t = jnp.minimum(head_time_t, ground_level)
        cols.append(jnp.broadcast_to(head_time_t.reshape(-1, 1),
                                     (num_nodes, prediction_steps)))
        original = head_step.shape[1]
        head_step = jnp.concatenate([head_step, head_time_t], axis=1)[:, -original:]
    return jnp.concatenate(cols, axis=1)


# ---------------------------------------------------------------------------
# Driver
# ---------------------------------------------------------------------------
if __name__ == "__main__":
    batch_size = 2
    steps_behind = 3
    prediction_steps = 1
    length_simulation = 4
    hidden_dim = 32
    n_hidden_layers = 2
    num_nodes = batch_size * NUM_NODES

    key = jax.random.PRNGKey(0)
    k_layer, k_res, k_hx, k_run, k_el, k_gl = jax.random.split(key, 6)

    # "layer": (steps_behind*2 + 1)*NUM_NODES -> NUM_NODES, n_hidden_layers hidden
    params_layer = init_mlp(k_layer, (steps_behind * 2 + 1) * NUM_NODES, NUM_NODES,
                            hidden_dim, n_hidden_layers)
    # "res_layer": NUM_NODES -> NUM_NODES, exactly 1 hidden layer
    params_res = init_mlp(k_res, NUM_NODES, NUM_NODES, hidden_dim, 1)

    norm_h_x = jax.random.normal(k_hx, (num_nodes, steps_behind), jnp.float32)
    norm_runoff = jax.random.normal(
        k_run, (num_nodes, steps_behind + length_simulation), jnp.float32)
    norm_elevation = -jnp.abs(jax.random.normal(k_el, (num_nodes,), jnp.float32)) - 1.0
    norm_ground_level = jnp.abs(jax.random.normal(k_gl, (num_nodes,), jnp.float32)) + 1.0

    out = mlp_benchmark_forward(
        params_layer, params_res,
        norm_h_x, norm_runoff, norm_elevation, norm_ground_level,
        batch_size=batch_size, steps_behind=steps_behind,
        length_simulation=length_simulation, prediction_steps=prediction_steps,
        non_linearity="relu",
    )
    out = jax.block_until_ready(out)
    assert out.shape == (num_nodes, length_simulation)
    assert bool(jnp.all(jnp.isfinite(out)))

    ref = _reference_forward(
        params_layer, params_res,
        norm_h_x, norm_runoff, norm_elevation, norm_ground_level,
        batch_size=batch_size, steps_behind=steps_behind,
        length_simulation=length_simulation, prediction_steps=prediction_steps,
        non_linearity="relu",
    )
    max_err = float(jnp.max(jnp.abs(out - ref)))
    assert max_err < 2e-2, f"mismatch vs reference, max abs err = {max_err}"

    print("KERNEL_OK")
</pallas_src>

<mosaic_0001>
module attributes {stable_mosaic.version = 11 : i64} {
  func.func @kernel(%arg0: i32, %arg1: memref<1x2x1244xf32, #tpu.memory_space<vmem>>, %arg2: memref<3x2x311xf32, #tpu.memory_space<vmem>>, %arg3: memref<2x311xf32, #tpu.memory_space<vmem>>, %arg4: memref<2x311xf32, #tpu.memory_space<vmem>>, %arg5: memref<2x311xf32, #tpu.memory_space<vmem>>, %arg6: memref<3x311x32xf32, #tpu.memory_space<vmem>>, %arg7: memref<1244x32xf32, #tpu.memory_space<vmem>>, %arg8: memref<1x32xf32, #tpu.memory_space<vmem>>, %arg9: memref<32x32xf32, #tpu.memory_space<vmem>>, %arg10: memref<1x32xf32, #tpu.memory_space<vmem>>, %arg11: memref<32x311xf32, #tpu.memory_space<vmem>>, %arg12: memref<1x311xf32, #tpu.memory_space<vmem>>, %arg13: memref<311x32xf32, #tpu.memory_space<vmem>>, %arg14: memref<1x32xf32, #tpu.memory_space<vmem>>, %arg15: memref<32x311xf32, #tpu.memory_space<vmem>>, %arg16: memref<1x311xf32, #tpu.memory_space<vmem>>, %arg17: memref<1x2x311xf32, #tpu.memory_space<vmem>>, %arg18: memref<3x2x311xf32, #tpu.memory_space<vmem>>, %arg19: memref<2x311xf32, #tpu.memory_space<vmem>>) attributes {dimension_semantics = [#tpu.dimension_semantics<arbitrary>], iteration_bounds = array<i64: 4>, scalar_prefetch = 0 : i64, scratch_operands = 2 : i64, tpu.core_type = #tpu.core_type<tc>, window_params = [{transform_indices = @transform_0, window_bounds = array<i64: 1, 2, 1244>}, {pipeline_mode = #tpu.pipeline_mode<synchronous>, transform_indices = @transform_1, window_bounds = array<i64: 3, 2, 311>}, {pipeline_mode = #tpu.pipeline_mode<synchronous>, transform_indices = @transform_2, window_bounds = array<i64: 2, 311>}, {pipeline_mode = #tpu.pipeline_mode<synchronous>, transform_indices = @transform_3, window_bounds = array<i64: 2, 311>}, {pipeline_mode = #tpu.pipeline_mode<synchronous>, transform_indices = @transform_4, window_bounds = array<i64: 2, 311>}, {pipeline_mode = #tpu.pipeline_mode<synchronous>, transform_indices = @transform_5, window_bounds = array<i64: 3, 311, 32>}, {pipeline_mode = #tpu.pipeline_mode<synchronous>, transform_indices = @transform_6, window_bounds = array<i64: 1244, 32>}, {pipeline_mode = #tpu.pipeline_mode<synchronous>, transform_indices = @transform_7, window_bounds = array<i64: 1, 32>}, {pipeline_mode = #tpu.pipeline_mode<synchronous>, transform_indices = @transform_8, window_bounds = array<i64: 32, 32>}, {pipeline_mode = #tpu.pipeline_mode<synchronous>, transform_indices = @transform_9, window_bounds = array<i64: 1, 32>}, {pipeline_mode = #tpu.pipeline_mode<synchronous>, transform_indices = @transform_10, window_bounds = array<i64: 32, 311>}, {pipeline_mode = #tpu.pipeline_mode<synchronous>, transform_indices = @transform_11, window_bounds = array<i64: 1, 311>}, {pipeline_mode = #tpu.pipeline_mode<synchronous>, transform_indices = @transform_12, window_bounds = array<i64: 311, 32>}, {pipeline_mode = #tpu.pipeline_mode<synchronous>, transform_indices = @transform_13, window_bounds = array<i64: 1, 32>}, {pipeline_mode = #tpu.pipeline_mode<synchronous>, transform_indices = @transform_14, window_bounds = array<i64: 32, 311>}, {pipeline_mode = #tpu.pipeline_mode<synchronous>, transform_indices = @transform_15, window_bounds = array<i64: 1, 311>}, {transform_indices = @transform_16, window_bounds = array<i64: 1, 2, 311>}]} {
    %c0_i32 = arith.constant 0 : i32
    %0 = arith.cmpi eq, %arg0, %c0_i32 : i32
    %1 = arith.extui %0 : i1 to i32
    %c0_i32_0 = arith.constant 0 : i32
    %2 = arith.cmpi ne, %1, %c0_i32_0 : i32
    scf.if %2 {
      %c0_75 = arith.constant 0 : index
      %c0_76 = arith.constant 0 : index
      %c0_77 = arith.constant 0 : index
      %79 = vector.load %arg2[%c0_75, %c0_76, %c0_77] : memref<3x2x311xf32, #tpu.memory_space<vmem>>, vector<3x2x311xf32>
      %c0_78 = arith.constant 0 : index
      %c0_79 = arith.constant 0 : index
      %c0_80 = arith.constant 0 : index
      %80 = vector.load %arg18[%c0_78, %c0_79, %c0_80] : memref<3x2x311xf32, #tpu.memory_space<vmem>>, vector<3x2x311xf32>
      tpu.vector_store %arg18[%c0_78, %c0_79, %c0_80], %79 {strides = array<i32>} : memref<3x2x311xf32, #tpu.memory_space<vmem>>, vector<3x2x311xf32>,
      %c0_81 = arith.constant 0 : index
      %c0_82 = arith.constant 0 : index
      %81 = vector.load %arg3[%c0_81, %c0_82] : memref<2x311xf32, #tpu.memory_space<vmem>>, vector<2x311xf32>
      %c0_83 = arith.constant 0 : index
      %c0_84 = arith.constant 0 : index
      %82 = vector.load %arg19[%c0_83, %c0_84] : memref<2x311xf32, #tpu.memory_space<vmem>>, vector<2x311xf32>
      tpu.vector_store %arg19[%c0_83, %c0_84], %81 {strides = array<i32>} : memref<2x311xf32, #tpu.memory_space<vmem>>, vector<2x311xf32>,
    } else {
    }
    %c0 = arith.constant 0 : index
    %c0_1 = arith.constant 0 : index
    %c0_2 = arith.constant 0 : index
    %3 = vector.load %arg1[%c0, %c0_1, %c0_2] : memref<1x2x1244xf32, #tpu.memory_space<vmem>>, vector<1x2x1244xf32>
    %4 = vector.shape_cast %3 : vector<1x2x1244xf32> to vector<2x1244xf32>
    %c0_3 = arith.constant 0 : index
    %c0_4 = arith.constant 0 : index
    %5 = vector.load %arg7[%c0_3, %c0_4] : memref<1244x32xf32, #tpu.memory_space<vmem>>, vector<1244x32xf32>
    %cst = arith.constant dense<0.000000e+00> : vector<2x32xf32>
    %6 = tpu.matmul %4, %5, %cst {dimension_numbers = #tpu.dot_dimension_numbers<[1], [0], [0], [1], [0, 0, 1, 1], [], []>} : vector<2x1244xf32>, vector<1244x32xf32>, vector<2x32xf32> -> vector<2x32xf32>
    %c0_5 = arith.constant 0 : index
    %c0_6 = arith.constant 0 : index
    %c0_7 = arith.constant 0 : index
    %7 = vector.load %arg18[%c0_5, %c0_6, %c0_7] : memref<3x2x311xf32, #tpu.memory_space<vmem>>, vector<1x2x311xf32>
    %8 = vector.shape_cast %7 : vector<1x2x311xf32> to vector<2x311xf32>
    %c0_8 = arith.constant 0 : index
    %c0_9 = arith.constant 0 : index
    %c0_10 = arith.constant 0 : index
    %9 = vector.load %arg6[%c0_8, %c0_9, %c0_10] : memref<3x311x32xf32, #tpu.memory_space<vmem>>, vector<1x311x32xf32>
    %10 = vector.shape_cast %9 : vector<1x311x32xf32> to vector<311x32xf32>
    %cst_11 = arith.constant dense<0.000000e+00> : vector<2x32xf32>
    %11 = tpu.matmul %8, %10, %cst_11 {dimension_numbers = #tpu.dot_dimension_numbers<[1], [0], [0], [1], [0, 0, 1, 1], [], []>} : vector<2x311xf32>, vector<311x32xf32>, vector<2x32xf32> -> vector<2x32xf32>
    %12 = arith.addf %6, %11 : vector<2x32xf32>
    %c1 = arith.constant 1 : index
    %c0_12 = arith.constant 0 : index
    %c0_13 = arith.constant 0 : index
    %13 = vector.load %arg18[%c1, %c0_12, %c0_13] : memref<3x2x311xf32, #tpu.memory_space<vmem>>, vector<1x2x311xf32>
    %14 = vector.shape_cast %13 : vector<1x2x311xf32> to vector<2x311xf32>
    %c1_14 = arith.constant 1 : index
    %c0_15 = arith.constant 0 : index
    %c0_16 = arith.constant 0 : index
    %15 = vector.load %arg6[%c1_14, %c0_15, %c0_16] : memref<3x311x32xf32, #tpu.memory_space<vmem>>, vector<1x311x32xf32>
    %16 = vector.shape_cast %15 : vector<1x311x32xf32> to vector<311x32xf32>
    %cst_17 = arith.constant dense<0.000000e+00> : vector<2x32xf32>
    %17 = tpu.matmul %14, %16, %cst_17 {dimension_numbers = #tpu.dot_dimension_numbers<[1], [0], [0], [1], [0, 0, 1, 1], [], []>} : vector<2x311xf32>, vector<311x32xf32>, vector<2x32xf32> -> vector<2x32xf32>
    %18 = arith.addf %12, %17 : vector<2x32xf32>
    %c2 = arith.constant 2 : index
    %c0_18 = arith.constant 0 : index
    %c0_19 = arith.constant 0 : index
    %19 = vector.load %arg18[%c2, %c0_18, %c0_19] : memref<3x2x311xf32, #tpu.memory_space<vmem>>, vector<1x2x311xf32>
    %20 = vector.shape_cast %19 : vector<1x2x311xf32> to vector<2x311xf32>
    %c2_20 = arith.constant 2 : index
    %c0_21 = arith.constant 0 : index
    %c0_22 = arith.constant 0 : index
    %21 = vector.load %arg6[%c2_20, %c0_21, %c0_22] : memref<3x311x32xf32, #tpu.memory_space<vmem>>, vector<1x311x32xf32>
    %22 = vector.shape_cast %21 : vector<1x311x32xf32> to vector<311x32xf32>
    %cst_23 = arith.constant dense<0.000000e+00> : vector<2x32xf32>
    %23 = tpu.matmul %20, %22, %cst_23 {dimension_numbers = #tpu.dot_dimension_numbers<[1], [0], [0], [1], [0, 0, 1, 1], [], []>} : vector<2x311xf32>, vector<311x32xf32>, vector<2x32xf32> -> vector<2x32xf32>
    %24 = arith.addf %18, %23 : vector<2x32xf32>
    %c0_24 = arith.constant 0 : index
    %c0_25 = arith.constant 0 : index
    %25 = vector.load %arg8[%c0_24, %c0_25] : memref<1x32xf32, #tpu.memory_space<vmem>>, vector<1x32xf32>
    %26 = vector.broadcast %25 : vector<1x32xf32> to vector<2x32xf32>
    %27 = arith.addf %24, %26 : vector<2x32xf32>
    %cst_26 = arith.constant 0.000000e+00 : f32
    %28 = vector.broadcast %cst_26 : f32 to vector<2x32xf32>
    %29 = arith.maximumf %27, %28 : vector<2x32xf32>
    %c0_27 = arith.constant 0 : index
    %c0_28 = arith.constant 0 : index
    %30 = vector.load %arg9[%c0_27, %c0_28] : memref<32x32xf32, #tpu.memory_space<vmem>>, vector<32x32xf32>
    %cst_29 = arith.constant dense<0.000000e+00> : vector<2x32xf32>
    %31 = tpu.matmul %29, %30, %cst_29 {dimension_numbers = #tpu.dot_dimension_numbers<[1], [0], [0], [1], [0, 0, 1, 1], [], []>} : vector<2x32xf32>, vector<32x32xf32>, vector<2x32xf32> -> vector<2x32xf32>
    %c0_30 = arith.constant 0 : index
    %c0_31 = arith.constant 0 : index
    %32 = vector.load %arg10[%c0_30, %c0_31] : memref<1x32xf32, #tpu.memory_space<vmem>>, vector<1x32xf32>
    %33 = vector.broadcast %32 : vector<1x32xf32> to vector<2x32xf32>
    %34 = arith.addf %31, %33 : vector<2x32xf32>
    %cst_32 = arith.constant 0.000000e+00 : f32
    %35 = vector.broadcast %cst_32 : f32 to vector<2x32xf32>
    %36 = arith.maximumf %34, %35 : vector<2x32xf32>
    %c0_33 = arith.constant 0 : index
    %c0_34 = arith.constant 0 : index
    %37 = vector.load %arg11[%c0_33, %c0_34] : memref<32x311xf32, #tpu.memory_space<vmem>>, vector<32x311xf32>
    %cst_35 = arith.constant dense<0.000000e+00> : vector<2x311xf32>
    %38 = tpu.matmul %36, %37, %cst_35 {dimension_numbers = #tpu.dot_dimension_numbers<[1], [0], [0], [1], [0, 0, 1, 1], [], []>} : vector<2x32xf32>, vector<32x311xf32>, vector<2x311xf32> -> vector<2x311xf32>
    %c0_36 = arith.constant 0 : index
    %c0_37 = arith.constant 0 : index
    %39 = vector.load %arg12[%c0_36, %c0_37] : memref<1x311xf32, #tpu.memory_space<vmem>>, vector<1x311xf32>
    %40 = vector.broadcast %39 : vector<1x311xf32> to vector<2x311xf32>
    %41 = arith.addf %38, %40 : vector<2x311xf32>
    %42 = math.tanh %41 : vector<2x311xf32>
    %c0_38 = arith.constant 0 : index
    %c0_39 = arith.constant 0 : index
    %43 = vector.load %arg19[%c0_38, %c0_39] : memref<2x311xf32, #tpu.memory_space<vmem>>, vector<2x311xf32>
    %c0_40 = arith.constant 0 : index
    %c0_41 = arith.constant 0 : index
    %44 = vector.load %arg13[%c0_40, %c0_41] : memref<311x32xf32, #tpu.memory_space<vmem>>, vector<311x32xf32>
    %cst_42 = arith.constant dense<0.000000e+00> : vector<2x32xf32>
    %45 = tpu.matmul %43, %44, %cst_42 {dimension_numbers = #tpu.dot_dimension_numbers<[1], [0], [0], [1], [0, 0, 1, 1], [], []>} : vector<2x311xf32>, vector<311x32xf32>, vector<2x32xf32> -> vector<2x32xf32>
    %c0_43 = arith.constant 0 : index
    %c0_44 = arith.constant 0 : index
    %46 = vector.load %arg14[%c0_43, %c0_44] : memref<1x32xf32, #tpu.memory_space<vmem>>, vector<1x32xf32>
    %47 = vector.broadcast %46 : vector<1x32xf32> to vector<2x32xf32>
    %48 = arith.addf %45, %47 : vector<2x32xf32>
    %cst_45 = arith.constant 0.000000e+00 : f32
    %49 = vector.broadcast %cst_45 : f32 to vector<2x32xf32>
    %50 = arith.maximumf %48, %49 : vector<2x32xf32>
    %c0_46 = arith.constant 0 : index
    %c0_47 = arith.constant 0 : index
    %51 = vector.load %arg15[%c0_46, %c0_47] : memref<32x311xf32, #tpu.memory_space<vmem>>, vector<32x311xf32>
    %cst_48 = arith.constant dense<0.000000e+00> : vector<2x311xf32>
    %52 = tpu.matmul %50, %51, %cst_48 {dimension_numbers = #tpu.dot_dimension_numbers<[1], [0], [0], [1], [0, 0, 1, 1], [], []>} : vector<2x32xf32>, vector<32x311xf32>, vector<2x311xf32> -> vector<2x311xf32>
    %c0_49 = arith.constant 0 : index
    %c0_50 = arith.constant 0 : index
    %53 = vector.load %arg16[%c0_49, %c0_50] : memref<1x311xf32, #tpu.memory_space<vmem>>, vector<1x311xf32>
    %54 = vector.broadcast %53 : vector<1x311xf32> to vector<2x311xf32>
    %55 = arith.addf %52, %54 : vector<2x311xf32>
    %56 = math.tanh %55 : vector<2x311xf32>
    %57 = arith.addf %56, %42 : vector<2x311xf32>
    %c0_51 = arith.constant 0 : index
    %c0_52 = arith.constant 0 : index
    %58 = vector.load %arg4[%c0_51, %c0_52] : memref<2x311xf32, #tpu.memory_space<vmem>>, vector<2x311xf32>
    %59 = arith.maximumf %57, %58 : vector<2x311xf32>
    %c0_53 = arith.constant 0 : index
    %c0_54 = arith.constant 0 : index
    %60 = vector.load %arg5[%c0_53, %c0_54] : memref<2x311xf32, #tpu.memory_space<vmem>>, vector<2x311xf32>
    %61 = arith.minimumf %59, %60 : vector<2x311xf32>
    %c0_55 = arith.constant 0 : index
    %c0_56 = arith.constant 0 : index
    %c0_57 = arith.constant 0 : index
    %62 = vector.load %arg17[%c0_55, %c0_56, %c0_57] : memref<1x2x311xf32, #tpu.memory_space<vmem>>, vector<1x2x311xf32>
    %63 = vector.shape_cast %62 : vector<1x2x311xf32> to vector<2x311xf32>
    %64 = vector.shape_cast %61 : vector<2x311xf32> to vector<1x2x311xf32>
    tpu.vector_store %arg17[%c0_55, %c0_56, %c0_57], %64 {strides = array<i32>} : memref<1x2x311xf32, #tpu.memory_space<vmem>>, vector<1x2x311xf32>,
    %c1_58 = arith.constant 1 : index
    %c0_59 = arith.constant 0 : index
    %c0_60 = arith.constant 0 : index
    %65 = vector.load %arg18[%c1_58, %c0_59, %c0_60] : memref<3x2x311xf32, #tpu.memory_space<vmem>>, vector<1x2x311xf32>
    %66 = vector.shape_cast %65 : vector<1x2x311xf32> to vector<2x311xf32>
    %c0_61 = arith.constant 0 : index
    %c0_62 = arith.constant 0 : index
    %c0_63 = arith.constant 0 : index
    %67 = vector.load %arg18[%c0_61, %c0_62, %c0_63] : memref<3x2x311xf32, #tpu.memory_space<vmem>>, vector<1x2x311xf32>
    %68 = vector.shape_cast %67 : vector<1x2x311xf32> to vector<2x311xf32>
    %69 = vector.shape_cast %66 : vector<2x311xf32> to vector<1x2x311xf32>
    tpu.vector_store %arg18[%c0_61, %c0_62, %c0_63], %69 {strides = array<i32>} : memref<3x2x311xf32, #tpu.memory_space<vmem>>, vector<1x2x311xf32>,
    %c2_64 = arith.constant 2 : index
    %c0_65 = arith.constant 0 : index
    %c0_66 = arith.constant 0 : index
    %70 = vector.load %arg18[%c2_64, %c0_65, %c0_66] : memref<3x2x311xf32, #tpu.memory_space<vmem>>, vector<1x2x311xf32>
    %71 = vector.shape_cast %70 : vector<1x2x311xf32> to vector<2x311xf32>
    %c1_67 = arith.constant 1 : index
    %c0_68 = arith.constant 0 : index
    %c0_69 = arith.constant 0 : index
    %72 = vector.load %arg18[%c1_67, %c0_68, %c0_69] : memref<3x2x311xf32, #tpu.memory_space<vmem>>, vector<1x2x311xf32>
    %73 = vector.shape_cast %72 : vector<1x2x311xf32> to vector<2x311xf32>
    %74 = vector.shape_cast %71 : vector<2x311xf32> to vector<1x2x311xf32>
    tpu.vector_store %arg18[%c1_67, %c0_68, %c0_69], %74 {strides = array<i32>} : memref<3x2x311xf32, #tpu.memory_space<vmem>>, vector<1x2x311xf32>,
    %c2_70 = arith.constant 2 : index
    %c0_71 = arith.constant 0 : index
    %c0_72 = arith.constant 0 : index
    %75 = vector.load %arg18[%c2_70, %c0_71, %c0_72] : memref<3x2x311xf32, #tpu.memory_space<vmem>>, vector<1x2x311xf32>
    %76 = vector.shape_cast %75 : vector<1x2x311xf32> to vector<2x311xf32>
    %77 = vector.shape_cast %61 : vector<2x311xf32> to vector<1x2x311xf32>
    tpu.vector_store %arg18[%c2_70, %c0_71, %c0_72], %77 {strides = array<i32>} : memref<3x2x311xf32, #tpu.memory_space<vmem>>, vector<1x2x311xf32>,
    %c0_73 = arith.constant 0 : index
    %c0_74 = arith.constant 0 : index
    %78 = vector.load %arg19[%c0_73, %c0_74] : memref<2x311xf32, #tpu.memory_space<vmem>>, vector<2x311xf32>
    tpu.vector_store %arg19[%c0_73, %c0_74], %61 {strides = array<i32>} : memref<2x311xf32, #tpu.memory_space<vmem>>, vector<2x311xf32>,
    return
  }
  func.func @transform_0(%arg0: i32) -> (i32, i32, i32) {
    %c0_i32 = arith.constant 0 : i32
    %c0_i32_0 = arith.constant 0 : i32
    %c0_i32_1 = arith.constant 0 : i32
    return %arg0, %c0_i32, %c0_i32_0 : i32, i32, i32
  }
  func.func @transform_1(%arg0: i32) -> (i32, i32, i32) {
    %c0_i32 = arith.constant 0 : i32
    %c0_i32_0 = arith.constant 0 : i32
    %c0_i32_1 = arith.constant 0 : i32
    %c0_i32_2 = arith.constant 0 : i32
    return %c0_i32, %c0_i32_0, %c0_i32_1 : i32, i32, i32
  }
  func.func @transform_2(%arg0: i32) -> (i32, i32) {
    %c0_i32 = arith.constant 0 : i32
    %c0_i32_0 = arith.constant 0 : i32
    %c0_i32_1 = arith.constant 0 : i32
    return %c0_i32, %c0_i32_0 : i32, i32
  }
  func.func @transform_3(%arg0: i32) -> (i32, i32) {
    %c0_i32 = arith.constant 0 : i32
    %c0_i32_0 = arith.constant 0 : i32
    %c0_i32_1 = arith.constant 0 : i32
    return %c0_i32, %c0_i32_0 : i32, i32
  }
  func.func @transform_4(%arg0: i32) -> (i32, i32) {
    %c0_i32 = arith.constant 0 : i32
    %c0_i32_0 = arith.constant 0 : i32
    %c0_i32_1 = arith.constant 0 : i32
    return %c0_i32, %c0_i32_0 : i32, i32
  }
  func.func @transform_5(%arg0: i32) -> (i32, i32, i32) {
    %c0_i32 = arith.constant 0 : i32
    %c0_i32_0 = arith.constant 0 : i32
    %c0_i32_1 = arith.constant 0 : i32
    %c0_i32_2 = arith.constant 0 : i32
    return %c0_i32, %c0_i32_0, %c0_i32_1 : i32, i32, i32
  }
  func.func @transform_6(%arg0: i32) -> (i32, i32) {
    %c0_i32 = arith.constant 0 : i32
    %c0_i32_0 = arith.constant 0 : i32
    %c0_i32_1 = arith.constant 0 : i32
    return %c0_i32, %c0_i32_0 : i32, i32
  }
  func.func @transform_7(%arg0: i32) -> (i32, i32) {
    %c0_i32 = arith.constant 0 : i32
    %c0_i32_0 = arith.constant 0 : i32
    %c0_i32_1 = arith.constant 0 : i32
    return %c0_i32, %c0_i32_0 : i32, i32
  }
  func.func @transform_8(%arg0: i32) -> (i32, i32) {
    %c0_i32 = arith.constant 0 : i32
    %c0_i32_0 = arith.constant 0 : i32
    %c0_i32_1 = arith.constant 0 : i32
    return %c0_i32, %c0_i32_0 : i32, i32
  }
  func.func @transform_9(%arg0: i32) -> (i32, i32) {
    %c0_i32 = arith.constant 0 : i32
    %c0_i32_0 = arith.constant 0 : i32
    %c0_i32_1 = arith.constant 0 : i32
    return %c0_i32, %c0_i32_0 : i32, i32
  }
  func.func @transform_10(%arg0: i32) -> (i32, i32) {
    %c0_i32 = arith.constant 0 : i32
    %c0_i32_0 = arith.constant 0 : i32
    %c0_i32_1 = arith.constant 0 : i32
    return %c0_i32, %c0_i32_0 : i32, i32
  }
  func.func @transform_11(%arg0: i32) -> (i32, i32) {
    %c0_i32 = arith.constant 0 : i32
    %c0_i32_0 = arith.constant 0 : i32
    %c0_i32_1 = arith.constant 0 : i32
    return %c0_i32, %c0_i32_0 : i32, i32
  }
  func.func @transform_12(%arg0: i32) -> (i32, i32) {
    %c0_i32 = arith.constant 0 : i32
    %c0_i32_0 = arith.constant 0 : i32
    %c0_i32_1 = arith.constant 0 : i32
    return %c0_i32, %c0_i32_0 : i32, i32
  }
  func.func @transform_13(%arg0: i32) -> (i32, i32) {
    %c0_i32 = arith.constant 0 : i32
    %c0_i32_0 = arith.constant 0 : i32
    %c0_i32_1 = arith.constant 0 : i32
    return %c0_i32, %c0_i32_0 : i32, i32
  }
  func.func @transform_14(%arg0: i32) -> (i32, i32) {
    %c0_i32 = arith.constant 0 : i32
    %c0_i32_0 = arith.constant 0 : i32
    %c0_i32_1 = arith.constant 0 : i32
    return %c0_i32, %c0_i32_0 : i32, i32
  }
  func.func @transform_15(%arg0: i32) -> (i32, i32) {
    %c0_i32 = arith.constant 0 : i32
    %c0_i32_0 = arith.constant 0 : i32
    %c0_i32_1 = arith.constant 0 : i32
    return %c0_i32, %c0_i32_0 : i32, i32
  }
  func.func @transform_16(%arg0: i32) -> (i32, i32, i32) {
    %c0_i32 = arith.constant 0 : i32
    %c0_i32_0 = arith.constant 0 : i32
    %c0_i32_1 = arith.constant 0 : i32
    return %arg0, %c0_i32, %c0_i32_0 : i32, i32, i32
  }
}

</mosaic_0001>

<bundles_post_ra>
// kernel: squeeze.1
= control target key start
LH: loop header
LB: loop body
LE: loop exit
PB: predicated region body
PF: predicated region fallthrough
CT: control target
= control target key end

     0   :  { %vm4_vm0 = vcmask 449536   ;;  %s55_s12 = smov 73   ;;  %vm20_vm1 = vcmask 1048136   ;;  %vm27_vm2 = vcmask 596992   ;;  %s90_s0 = inlined_call_operand.vmem [shape: f32[622], index: 0, kind: input, shape index: {}]   ;;  %s91_s1 = inlined_call_operand.vmem [shape: f32[2,311], index: 1, kind: output, shape index: {}]  }
   0x1   :  { %v49_v0 = vld [vmem:[%s90_s0 + $0x4] sm:$0x1]   ;;  %v48_v3 = vld [vmem:[%s90_s0 + $0x2] sm:$0x1]   ;;  %v7_v4 = vld [vmem:[%s90_s0] sm:$0x3]  }
   0x2   :  { %v50_v1 = vld [vmem:[%s90_s0 + $0x3] sm:$0x3]   ;;  %6 = vst.msk [vmem:[#allocation0 + $0x10] sm:$0x1] %vm4_vm0, %v48_v3  }
   0x3   :  { %v14_v2 = vsel %vm4_vm0, %v50_v1, %v49_v0  ;;  %v51_v5 = vld [vmem:[%s90_s0 + $0x2] sm:$0x3]   ;;  %8 = vst [vmem:[#allocation0] ss:$8 sm:$0x3] %v7_v4  }
   0x4   :  { %15 = vrot.lane.b32.xlu0 %v14_v2, %s55_s12 }
   0x8   :  { %25 = vrot.lane.b32.xlu0 %v51_v5, %s55_s12 }
  0x76   :  { %v16_v6 = vpop.permute.xlu0 %15  }
  0x77   :  { %19 = vst.msk [vmem:[#allocation0 + $0x11] sm:$0x1] %vm4_vm0, %v16_v6  }
  0x78   :  { %22 = vst.msk [vmem:[#allocation0 + $0x1] ss:$8 sm:$0x3] %vm20_vm1, %v16_v6  }
  0x7a   :  { %v26_v7 = vpop.permute.xlu0 %25  }
  0x7b   :  { %29 = vst.msk [vmem:[#allocation0 + $0x1] ss:$8 sm:$0x3] %vm27_vm2, %v26_v7  }
  0x7e   :  { %v42_v8 = vld [vmem:[#allocation0 + $0x10] sm:$0x3] }
  0x7f   :  { %53 = vst [vmem:[%s91_s1 + $0x4] sm:$0x3] %v42_v8 }
  0x82   :  { %v33_v9 = vld [vmem:[#allocation0] sm:$0x3]  ;;  %v37_v10 = vld [vmem:[#allocation0 + $0x8] sm:$0x3] }
  0x83   :  { %35 = vst [vmem:[%s91_s1] sm:$0x3] %v33_v9  ;;  %52 = vst [vmem:[%s91_s1 + $0x2] sm:$0x3] %v37_v10 }

// kernel: mlp_benchmark_forward.1
= control target key start
LH: loop header
LB: loop body
LE: loop exit
PB: predicated region body
PF: predicated region fallthrough
CT: control target
= control target key end

     0   :  { %s3563_s21 = smov 0   ;;  %s4803_s0 = inlined_call_operand.vmem [shape: f32[4,2,1244], index: 0, kind: input, shape index: {}]   ;;  %s4804_s1 = inlined_call_operand.vmem [shape: f32[3,2,311], index: 1, kind: input, shape index: {}]   ;;  %s4805_s2 = inlined_call_operand.vmem [shape: f32[2,311], index: 2, kind: input, shape index: {}]   ;;  %s4806_s3 = inlined_call_operand.vmem [shape: f32[2,311], index: 3, kind: input, shape index: {}]   ;;  %s4807_s4 = inlined_call_operand.vmem [shape: f32[2,311], index: 4, kind: input, shape index: {}]   ;;  %s4808_s5 = inlined_call_operand.vmem [shape: f32[3,311,32], index: 5, kind: input, shape index: {}]   ;;  %s4809_s6 = inlined_call_operand.vmem [shape: f32[1244,32], index: 6, kind: input, shape index: {}]   ;;  %s4810_s7 = inlined_call_operand.vmem [shape: f32[1,32], index: 7, kind: input, shape index: {}]   ;;  %s4811_s8 = inlined_call_operand.vmem [shape: f32[32,32], index: 8, kind: input, shape index: {}]   ;;  %s4812_s9 = inlined_call_operand.vmem [shape: f32[1,32], index: 9, kind: input, shape index: {}]   ;;  %s4813_s10 = inlined_call_operand.vmem [shape: f32[32,311], index: 10, kind: input, shape index: {}]   ;;  %s4814_s11 = inlined_call_operand.vmem [shape: f32[1,311], index: 11, kind: input, shape index: {}]   ;;  %s4815_s12 = inlined_call_operand.vmem [shape: f32[311,32], index: 12, kind: input, shape index: {}]   ;;  %s4816_s13 = inlined_call_operand.vmem [shape: f32[1,32], index: 13, kind: input, shape index: {}]   ;;  %s4817_s14 = inlined_call_operand.vmem [shape: f32[32,311], index: 14, kind: input, shape index: {}]   ;;  %s4818_s15 = inlined_call_operand.vmem [shape: f32[1,311], index: 15, kind: input, shape index: {}]   ;;  %s4819_s16 = inlined_call_operand.vmem [shape: f32[4,2,311], index: 16, kind: output, shape index: {}]  }
   0x1   :  { %4820 = sst [smem:[#allocation4_spill]] %s4803_s0 }
   0x2 LB: > { %s2526_s22 = sadd.s32 4294967295, %s3471_s21   ;;  %p2530_p0 = scmp.ge.s32.totalorder %s3471_s21, 1  ;;  %s3471_s21 = sphi %s3563_s21, %s26_s21  }
   0x3   : > { %p462_p1 = scmp.lt.s32.totalorder %s3471_s21, 5 }
   0x5   : > { %p463_p2 = pnand %p2530_p0, %p462_p1 }
   0x6   : > { %p512_p3 = scmp.lt.s32.totalorder (!%p463_p2), %s2526_s22, 3  ;;  %s4821_s28 = sld [smem:[#allocation4_spill]] (!%p463_p2) }
   0x7   : > { %466 = sbr.rel (%p463_p2) target bundleno = 1129 (0x469), region = 84  ;;  %p2533_p4 = scmp.ne.s32.totalorder (!%p463_p2), %s2526_s22, 0 }
   0xe   : > { %s513_s23 = scalar_select %p512_p3, %s2526_s22, 3 }
   0xf   : > { %525 = sbr.rel (%p2533_p4) target bundleno = 22 (0x16), region = 88  ;;  %v526_v0 = vld [vmem:[%s4804_s1] sm:$0x3f] (!%p2533_p4)  ;;  %vm529_vm0 = vcmask (!%p2533_p4), 1041408   ;;  %vm530_vm1 = vcmask (!%p2533_p4), 1043458   ;;  %vm532_vm2 = vcmask (!%p2533_p4), 447492  }
  0x10   : > { %s3430_s24 = smul.u32 20, %s513_s23  ;;  %vm531_vm3 = vmor (!%p2533_p4), %vm530_vm1, %vm529_vm0  ;;  %v527_v1 = vld [vmem:[%s4804_s1 + $0x6] sm:$0x3f] (!%p2533_p4)  ;;  %v528_v2 = vld [vmem:[%s4804_s1 + $0xc] sm:$0x3f] (!%p2533_p4) }
  0x11   : > { %s3431_s25 = smul.u32 6, %s513_s23  ;;  %vm533_vm4 = vmor (!%p2533_p4), %vm532_vm2, %vm531_vm3  ;;  %v537_v3 = vld [vmem:[%s4805_s2] sm:$0x3f] (!%p2533_p4) }
  0x12   : > { %s3574_s29 = scalar_lea.vmem %s4821_s28, %s3430_s24  ;;  %534 = vst.msk [vmem:[#allocation2] sm:$0x3f] (!%p2533_p4), %vm533_vm4, %v526_v0  ;;  %535 = vst.msk [vmem:[#allocation2 + $0x6] sm:$0x3f] (!%p2533_p4), %vm533_vm4, %v527_v1 }
  0x13   : > { %s3579_s17 = scalar_lea.vmem %s4819_s16, %s3431_s25  ;;  %536 = vst.msk [vmem:[#allocation2 + $0xc] sm:$0x3f] (!%p2533_p4), %vm533_vm4, %v528_v2  ;;  %538 = vst.msk [vmem:[#allocation3] sm:$0x3f] (!%p2533_p4), %vm533_vm4, %v537_v3 }
  0x16 PF: > { %v715_v4 = vld [vmem:[%s4808_s5 + $0x80] sm:$0xff]  ;;  %v716_v5 = vld [vmem:[%s4808_s5 + $0x88] sm:$0xff]  ;;  %v743_v7 = vlaneseq  ;;  %v3473_v8 = vmov 0.0|0.0   ;;  %v717_v15 = vld [vmem:[%s4808_s5 + $0x90] sm:$0xff]  ;;  %vm3474_vm5 = vmmov 0   ;;  %v3475_v18 = vmov 0.0  }
  0x17   : > { %v731_v6 = vld [vmem:[%s4808_s5 + $0x100] sm:$0xff]  ;;  %3093 = vmatprep.subr.bf16.mxu1 %v3473_v8  ;;  %v3061_v9 = vpack.c.bf16 %v716_v5, %v715_v4  ;;  %v732_v10 = vld [vmem:[%s4808_s5 + $0x108] sm:$0xff]  ;;  %v718_v16 = vld [vmem:[%s4808_s5 + $0x98] sm:$0xff]  ;;  %2974 = vmatprep.mubr.msk.f32.mxu1 %vm3474_vm5, %v3475_v18  ;;  %v3476_v19 = vmov 1983009808   ;;  %vm2459_vm6 = vcmask 1041408  }
  0x18   : > { %v699_v11 = vld [vmem:[%s4808_s5] sm:$0xff]  ;;  %v700_v12 = vld [vmem:[%s4808_s5 + $0x8] sm:$0xff]  ;;  %v3094_v13 = vpack.c.bf16 %v732_v10, %v731_v6  ;;  %v733_v17 = vld [vmem:[%s4808_s5 + $0x110] sm:$0xff]  ;;  %v741_v20 = vunpack.c.l.s4 %v3476_v19  ;;  %v3623_v21 = vshrl.u32 %v743_v7, 7  ;;  %v3065_v22 = vpack.c.bf16 %v718_v16, %v717_v15 }
  0x19   : > { %v3063_v14 = vpack.c.bf16 %v700_v12, %v699_v11  ;;  %3062 = vmatprep.subr.bf16.mxu0 %v3061_v9  ;;  %v734_v23 = vld [vmem:[%s4808_s5 + $0x118] sm:$0xff]  ;;  %v701_v24 = vld [vmem:[%s4808_s5 + $0x10] sm:$0xff]  ;;  %v719_v28 = vld [vmem:[%s4808_s5 + $0xa0] sm:$0xff]  ;;  %vm2460_vm7 = vcmask 1043458   ;;  %vm2462_vm8 = vcmask 447492   ;;  %vm760_vm11 = vcmask 1046528  }
  0x1a   : > { %v702_v25 = vld [vmem:[%s4808_s5 + $0x18] sm:$0xff]  ;;  %3095 = vmatpush3.bf16.msra.mxu1 %v3094_v13  ;;  %v3097_v26 = vpack.c.bf16 %v734_v23, %v733_v17  ;;  %v720_v29 = vld [vmem:[%s4808_s5 + $0xa8] sm:$0xff]  ;;  %v735_v30 = vld [vmem:[%s4808_s5 + $0x120] sm:$0xff]  ;;  %v742_v31 = vunpack.c.0.s8 %v741_v20  ;;  %vm757_vm12 = vcmask 449536   ;;  %vm958_vm13 = vcmask 752640  }
  0x1b   : > { %3064 = vmatpush3.bf16.msra.mxu0 %v3063_v14  ;;  %v3067_v27 = vpack.c.bf16 %v702_v25, %v701_v24  ;;  %3096 = vmatprep.subr.bf16.mxu1 %v3473_v8  ;;  %v3069_v32 = vpack.c.bf16 %v720_v29, %v719_v28  ;;  %v736_v33 = vld [vmem:[%s4808_s5 + $0x128] sm:$0xff]  ;;  %v703_v34 = vld [vmem:[%s4808_s5 + $0x20] sm:$0xff]  ;;  %v721_v36 = vld [vmem:[%s4808_s5 + $0xb0] sm:$0xff]  ;;  %vm961_vm14 = vcmask 1043456   ;;  %vm3477_vm15 = vmmov 1  }
  0x1c   : > { %3066 = vmatprep.subr.bf16.mxu0 %v3065_v22  ;;  %v704_v35 = vld [vmem:[%s4808_s5 + $0x28] sm:$0xff]  ;;  %v722_v37 = vld [vmem:[%s4808_s5 + $0xb8] sm:$0xff]  ;;  %v3660_v38 = vsub.s32 %v742_v31, %v3623_v21  ;;  %v698_v39 = vld [vmem:[#allocation2] sm:$0x3f]  ;;  %v3100_v40 = vpack.c.bf16 %v736_v33, %v735_v30  ;;  %vm1749_vm1 = vcmask 261120  }
  0x1d   : > { %v3071_v41 = vpack.c.bf16 %v704_v35, %v703_v34  ;;  %vm2461_vm9 = vmor %vm2460_vm7, %vm2459_vm6  ;;  %v2465_v42 = vld [vmem:[#allocation2 + $0x6] sm:$0x3f]  ;;  %v3073_v44 = vpack.c.bf16 %v722_v37, %v721_v36  ;;  %v705_v45 = vld [vmem:[%s4808_s5 + $0x30] sm:$0xff]  ;;  %v739_v47 = vcombine.high %v698_v39, %v698_v39 }
  0x1e   : > { %3098 = vmatpush3.bf16.msra.mxu1 %v3097_v26  ;;  %v3663_v43 = vrot.slane %v698_v39, %v3660_v38  ;;  %v706_v46 = vld [vmem:[%s4808_s5 + $0x38] sm:$0xff]  ;;  %vm3673_vm10 = vmor %vm2462_vm8, %vm2461_vm9  ;;  %v558_v49 = vld [vmem:[%s4809_s6 + $0x80] sm:$0xff] }
  0x1f   : > { %3068 = vmatpush3.bf16.msra.mxu0 %v3067_v27  ;;  %3099 = vmatprep.subr.bf16.mxu1 %v3473_v8  ;;  %2466 = vst.msk [vmem:[#allocation2] sm:$0x3f] %vm3673_vm10, %v2465_v42  ;;  %v559_v50 = vld [vmem:[%s4809_s6 + $0x88] sm:$0xff]  ;;  %v542_v51 = vld [vmem:[%s4809_s6] sm:$0xff]  ;;  %v3075_v56 = vpack.c.bf16 %v706_v46, %v705_v45  ;;  %v560_v57 = vld [vmem:[%s4809_s6 + $0x90] sm:$0xff]  ;;  %v753_v60 = vrot.slane %v739_v47, %v3660_v38 }
  0x20   : > { %3070 = vmatprep.subr.bf16.mxu0 %v3069_v32  ;;  %v754_v52 = vcombine.high %v3663_v43, %v3663_v43  ;;  %v543_v53 = vld [vmem:[%s4809_s6 + $0x8] sm:$0xff]  ;;  %v723_v54 = vld [vmem:[%s4808_s5 + $0xc0] sm:$0xff]  ;;  %v561_v58 = vld [vmem:[%s4809_s6 + $0x98] sm:$0xff]  ;;  %v3102_v61 = vpack.c.bf16 %v559_v50, %v558_v49 }
  0x21   : > { %v724_v55 = vld [vmem:[%s4808_s5 + $0xc8] sm:$0xff]  ;;  %v737_v59 = vld [vmem:[%s4808_s5 + $0x130] sm:$0x7f]  ;;  %v707_v62 = vld [vmem:[%s4808_s5 + $0x40] sm:$0xff]  ;;  %v3104_v0 = vpack.c.bf16 %v543_v53, %v542_v51  ;;  %v3106_v4 = vpack.c.bf16 %v561_v58, %v560_v57 }
  0x22   : > { %3101 = vmatpush3.bf16.msra.mxu1 %v3100_v40  ;;  %v708_v63 = vld [vmem:[%s4808_s5 + $0x48] sm:$0xff]  ;;  %v3077_v1 = vpack.c.bf16 %v724_v55, %v723_v54  ;;  %v725_v2 = vld [vmem:[%s4808_s5 + $0xd0] sm:$0xff]  ;;  %v726_v3 = vld [vmem:[%s4808_s5 + $0xd8] sm:$0xff]  ;;  %828 = vmatprep.mubr.f32.mxu0 %v754_v52 }
  0x23   : > { %3072 = vmatpush3.bf16.msra.mxu0 %v3071_v41  ;;  %2972 = vmatprep.subr.mxu1 %v3475_v18  ;;  %v544_v5 = vld [vmem:[%s4809_s6 + $0x10] sm:$0xff]  ;;  %v545_v6 = vld [vmem:[%s4809_s6 + $0x18] sm:$0xff]  ;;  %v3079_v7 = vpack.c.bf16 %v708_v63, %v707_v62  ;;  %v562_v9 = vld [vmem:[%s4809_s6 + $0xa0] sm:$0xff]  ;;  %v3081_v11 = vpack.c.bf16 %v726_v3, %v725_v2 }
  0x24   : > { %3074 = vmatprep.subr.bf16.mxu0 %v3073_v44  ;;  %v563_v10 = vld [vmem:[%s4809_s6 + $0xa8] sm:$0xff]  ;;  %v709_v12 = vld [vmem:[%s4808_s5 + $0x50] sm:$0xff]  ;;  %v710_v13 = vld [vmem:[%s4808_s5 + $0x58] sm:$0xff]  ;;  %v3108_v14 = vpack.c.bf16 %v545_v6, %v544_v5 }
  0x25   : > { %v727_v15 = vld [vmem:[%s4808_s5 + $0xe0] sm:$0xff]  ;;  %v728_v16 = vld [vmem:[%s4808_s5 + $0xe8] sm:$0xff]  ;;  %v3110_v17 = vpack.c.bf16 %v563_v10, %v562_v9  ;;  %v3083_v22 = vpack.c.bf16 %v710_v13, %v709_v12  ;;  %v564_v23 = vld [vmem:[%s4809_s6 + $0xb0] sm:$0xff] }
  0x26   : > { %2973 = vmatpush3.msk.msra.mxu1 %vm760_vm11, %v737_v59  ;;  %v546_v19 = vld [vmem:[%s4809_s6 + $0x20] sm:$0xff]  ;;  %v547_v20 = vld [vmem:[%s4809_s6 + $0x28] sm:$0xff]  ;;  %v565_v24 = vld [vmem:[%s4809_s6 + $0xb8] sm:$0xff]  ;;  %v3085_v25 = vpack.c.bf16 %v728_v16, %v727_v15 }
  0x27   : > { %3076 = vmatpush3.bf16.msra.mxu0 %v3075_v56  ;;  %2975 = vmatmul.mubr.msk.f32.vlgmr.msra.gmra.mrb[0].mxu1 %vm757_vm12, %v753_v60  ;;  %v711_v26 = vld [vmem:[%s4808_s5 + $0x60] sm:$0xff]  ;;  %v712_v27 = vld [vmem:[%s4808_s5 + $0x68] sm:$0xff]  ;;  %v3112_v28 = vpack.c.bf16 %v547_v20, %v546_v19  ;;  %v729_v29 = vld [vmem:[%s4808_s5 + $0xf0] sm:$0xff]  ;;  %v3114_v31 = vpack.c.bf16 %v565_v24, %v564_v23 }
  0x28   : > { %3103 = vmatprep.subr.bf16.mxu1 %v3102_v61  ;;  %3078 = vmatprep.subr.bf16.mxu0 %v3077_v1  ;;  %v730_v30 = vld [vmem:[%s4808_s5 + $0xf8] sm:$0xff]  ;;  %v548_v32 = vld [vmem:[%s4809_s6 + $0x30] sm:$0xff]  ;;  %v3087_v34 = vpack.c.bf16 %v712_v27, %v711_v26  ;;  %v566_v35 = vld [vmem:[%s4809_s6 + $0xc0] sm:$0xff] }
  0x29   : > { %3105 = vmatpush3.bf16.msra.mxu1 %v3104_v0  ;;  %v549_v33 = vld [vmem:[%s4809_s6 + $0x38] sm:$0xff]  ;;  %v567_v36 = vld [vmem:[%s4809_s6 + $0xc8] sm:$0xff]  ;;  %v3089_v37 = vpack.c.bf16 %v730_v30, %v729_v29  ;;  %v713_v39 = vld [vmem:[%s4808_s5 + $0x70] sm:$0xff] }
  0x2a   : > { %3107 = vmatprep.subr.bf16.mxu1 %v3106_v4  ;;  %v714_v40 = vld [vmem:[%s4808_s5 + $0x78] sm:$0xff]  ;;  %v3116_v41 = vpack.c.bf16 %v549_v33, %v548_v32  ;;  %v590_v42 = vld [vmem:[%s4809_s6 + $0x180] sm:$0xff]  ;;  %v591_v44 = vld [vmem:[%s4809_s6 + $0x188] sm:$0xff]  ;;  %v3118_v45 = vpack.c.bf16 %v567_v36, %v566_v35 }
  0x2b   : > { %3080 = vmatpush3.bf16.msra.mxu0 %v3079_v7  ;;  %v550_v46 = vld [vmem:[%s4809_s6 + $0x40] sm:$0xff]  ;;  %v551_v47 = vld [vmem:[%s4809_s6 + $0x48] sm:$0xff]  ;;  %v3091_v49 = vpack.c.bf16 %v714_v40, %v713_v39  ;;  %v568_v50 = vld [vmem:[%s4809_s6 + $0xd0] sm:$0xff]  ;;  %v3134_v52 = vpack.c.bf16 %v591_v44, %v590_v42 }
  0x2c   : > { %3082 = vmatprep.subr.bf16.mxu0 %v3081_v11  ;;  %v569_v51 = vld [vmem:[%s4809_s6 + $0xd8] sm:$0xff]  ;;  %v574_v53 = vld [vmem:[%s4809_s6 + $0x100] sm:$0xff]  ;;  %v575_v54 = vld [vmem:[%s4809_s6 + $0x108] sm:$0xff]  ;;  %v3120_v56 = vpack.c.bf16 %v551_v47, %v550_v46 }
  0x2d   : > { %3109 = vmatpush3.bf16.msra.mxu1 %v3108_v14  ;;  %v539_v55 = vld [vmem:[%s3574_s29] sm:$0xff]  ;;  %v592_v57 = vld [vmem:[%s4809_s6 + $0x190] sm:$0xff]  ;;  %v593_v58 = vld [vmem:[%s4809_s6 + $0x198] sm:$0xff]  ;;  %v3122_v61 = vpack.c.bf16 %v569_v51, %v568_v50  ;;  %v3136_v0 = vpack.c.bf16 %v575_v54, %v574_v53 }
  0x2e   : > { %3111 = vmatprep.subr.bf16.mxu1 %v3110_v17  ;;  %v3822_v59 = vrot.slane %v539_v55, %v3660_v38  ;;  %v907_v60 = vcombine.high %v539_v55, %v539_v55  ;;  %v552_v62 = vld [vmem:[%s4809_s6 + $0x50] sm:$0xff]  ;;  %v553_v63 = vld [vmem:[%s4809_s6 + $0x58] sm:$0xff]  ;;  %v570_v1 = vld [vmem:[%s4809_s6 + $0xe0] sm:$0xff]  ;;  %v3138_v5 = vpack.c.bf16 %v593_v58, %v592_v57 }
  0x2f   : > { %3084 = vmatpush3.bf16.msra.mxu0 %v3083_v22  ;;  %v571_v2 = vld [vmem:[%s4809_s6 + $0xe8] sm:$0xff]  ;;  %v576_v6 = vld [vmem:[%s4809_s6 + $0x110] sm:$0xff]  ;;  %v577_v7 = vld [vmem:[%s4809_s6 + $0x118] sm:$0xff]  ;;  %v3124_v9 = vpack.c.bf16 %v553_v63, %v552_v62 }
  0x30   : > { %3086 = vmatprep.subr.bf16.mxu0 %v3085_v25  ;;  %v922_v3 = vcombine.high %v3822_v59, %v3822_v59  ;;  %v3839_v4 = vrot.slane %v907_v60, %v3660_v38  ;;  %v594_v10 = vld [vmem:[%s4809_s6 + $0x1a0] sm:$0xff]  ;;  %v595_v11 = vld [vmem:[%s4809_s6 + $0x1a8] sm:$0xff]  ;;  %v3126_v13 = vpack.c.bf16 %v571_v2, %v570_v1  ;;  %v3140_v16 = vpack.c.bf16 %v577_v7, %v576_v6  ;;  %v572_v17 = vld [vmem:[%s4809_s6 + $0xf0] sm:$0xff] }
  0x31   : > { %3113 = vmatpush3.bf16.msra.mxu1 %v3112_v28  ;;  %v554_v14 = vld [vmem:[%s4809_s6 + $0x60] sm:$0xff]  ;;  %v555_v15 = vld [vmem:[%s4809_s6 + $0x68] sm:$0xff]  ;;  %v3142_v19 = vpack.c.bf16 %v595_v11, %v594_v10  ;;  %v596_v24 = vld [vmem:[%s4809_s6 + $0x1b0] sm:$0xff] }
  0x32   : > { %3115 = vmatprep.subr.bf16.mxu1 %v3114_v31  ;;  %1029 = vmatprep.mubr.f32.mxu1 %v922_v3  ;;  %v923_v12 = vcombine.high %v3839_v4, %v3839_v4  ;;  %v578_v20 = vld [vmem:[%s4809_s6 + $0x120] sm:$0xff]  ;;  %v579_v22 = vld [vmem:[%s4809_s6 + $0x128] sm:$0xff]  ;;  %v3128_v23 = vpack.c.bf16 %v555_v15, %v554_v14  ;;  %v597_v25 = vld [vmem:[%s4809_s6 + $0x1b8] sm:$0xff] }
  0x33   : > { %3088 = vmatpush3.bf16.msra.mxu0 %v3087_v34  ;;  %v556_v27 = vld [vmem:[%s4809_s6 + $0x70] sm:$0xff]  ;;  %v557_v28 = vld [vmem:[%s4809_s6 + $0x78] sm:$0xff]  ;;  %v3144_v29 = vpack.c.bf16 %v579_v22, %v578_v20  ;;  %v622_v30 = vld [vmem:[%s4809_s6 + $0x280] sm:$0xff]  ;;  %v3146_v32 = vpack.c.bf16 %v597_v25, %v596_v24 }
  0x34   : > { %3090 = vmatprep.subr.bf16.mxu0 %v3089_v37  ;;  %v623_v31 = vld [vmem:[%s4809_s6 + $0x288] sm:$0xff]  ;;  %v580_v33 = vld [vmem:[%s4809_s6 + $0x130] sm:$0xff]  ;;  %v581_v34 = vld [vmem:[%s4809_s6 + $0x138] sm:$0xff]  ;;  %v3132_v35 = vpack.c.bf16 %v557_v28, %v556_v27 }
  0x35   : > { %3117 = vmatpush3.bf16.msra.mxu1 %v3116_v41  ;;  %v598_v36 = vld [vmem:[%s4809_s6 + $0x1c0] sm:$0xff]  ;;  %v599_v37 = vld [vmem:[%s4809_s6 + $0x1c8] sm:$0xff]  ;;  %v3166_v39 = vpack.c.bf16 %v623_v31, %v622_v30  ;;  %v3148_v42 = vpack.c.bf16 %v581_v34, %v580_v33  ;;  %v624_v44 = vld [vmem:[%s4809_s6 + $0x290] sm:$0xff] }
  0x36   : > { %3119 = vmatprep.subr.bf16.mxu1 %v3118_v45  ;;  %v606_v40 = vld [vmem:[%s4809_s6 + $0x200] sm:$0xff]  ;;  %v607_v41 = vld [vmem:[%s4809_s6 + $0x208] sm:$0xff]  ;;  %v625_v45 = vld [vmem:[%s4809_s6 + $0x298] sm:$0xff]  ;;  %v3150_v46 = vpack.c.bf16 %v599_v37, %v598_v36 }
  0x37   : > { %3092 = vmatpush3.bf16.msra.mxu0 %v3091_v49  ;;  %v582_v47 = vld [vmem:[%s4809_s6 + $0x140] sm:$0xff]  ;;  %v583_v49 = vld [vmem:[%s4809_s6 + $0x148] sm:$0xff]  ;;  %v3168_v50 = vpack.c.bf16 %v607_v41, %v606_v40  ;;  %v600_v51 = vld [vmem:[%s4809_s6 + $0x1d0] sm:$0xff]  ;;  %v3170_v53 = vpack.c.bf16 %v625_v45, %v624_v44 }
  0x38   : > { %3135 = vmatprep.subr.bf16.mxu0 %v3134_v52  ;;  %v601_v52 = vld [vmem:[%s4809_s6 + $0x1d8] sm:$0xff]  ;;  %v608_v54 = vld [vmem:[%s4809_s6 + $0x210] sm:$0xff]  ;;  %v626_v57 = vld [vmem:[%s4809_s6 + $0x2a0] sm:$0xff] }
  0x39   : > { %3121 = vmatpush3.bf16.msra.mxu1 %v3120_v56  ;;  %v609_v55 = vld [vmem:[%s4809_s6 + $0x218] sm:$0xff]  ;;  %v3152_v56 = vpack.c.bf16 %v583_v49, %v582_v47  ;;  %v627_v58 = vld [vmem:[%s4809_s6 + $0x2a8] sm:$0xff]  ;;  %v3154_v60 = vpack.c.bf16 %v601_v52, %v600_v51  ;;  %v610_v3 = vld [vmem:[%s4809_s6 + $0x220] sm:$0xff] }
  0x3a   : > { %829 = vmatmul.mubr.f32.vlgmr.msra.gmra.mrb[0].mxu0 %v3663_v43  ;;  %3123 = vmatprep.subr.bf16.mxu1 %v3122_v61  ;;  %v573_v43 = vld [vmem:[%s4809_s6 + $0xf8] sm:$0xff]  ;;  %v584_v61 = vld [vmem:[%s4809_s6 + $0x150] sm:$0xff]  ;;  %v3172_v63 = vpack.c.bf16 %v609_v55, %v608_v54  ;;  %v540_v1 = vld [vmem:[%s3574_s29 + $0x8] sm:$0xff]  ;;  %v3174_v2 = vpack.c.bf16 %v627_v58, %v626_v57 }
  0x3b   : > { %3137 = vmatpush3.bf16.msra.mxu0 %v3136_v0  ;;  %1099 = vmatprep.mubr.f32.mxu0 %v923_v12  ;;  %v3130_v26 = vpack.c.bf16 %v573_v43, %v572_v17  ;;  %v585_v62 = vld [vmem:[%s4809_s6 + $0x158] sm:$0xff]  ;;  %v602_v0 = vld [vmem:[%s4809_s6 + $0x1e0] sm:$0xff]  ;;  %v3961_v6 = vrot.slane %v540_v1, %v3660_v38  ;;  %v631_v24 = vld [vmem:[%s4809_s6 + $0x2c8] sm:$0xff]  ;;  %v924_v25 = vcombine.high %v540_v1, %v540_v1 }
  0x3c   : > { %3139 = vmatprep.subr.bf16.mxu0 %v3138_v5  ;;  %v611_v5 = vld [vmem:[%s4809_s6 + $0x228] sm:$0xff]  ;;  %v3156_v7 = vpack.c.bf16 %v585_v62, %v584_v61  ;;  %v629_v10 = vld [vmem:[%s4809_s6 + $0x2b8] sm:$0xff]  ;;  %v586_v12 = vld [vmem:[%s4809_s6 + $0x160] sm:$0xff] }
  0x3d   : > { %3125 = vmatpush3.bf16.msra.mxu1 %v3124_v9  ;;  %v628_v9 = vld [vmem:[%s4809_s6 + $0x2b0] sm:$0xff]  ;;  %v939_v14 = vcombine.high %v3961_v6, %v3961_v6  ;;  %v3176_v15 = vpack.c.bf16 %v611_v5, %v610_v3  ;;  %v605_v17 = vld [vmem:[%s4809_s6 + $0x1f8] sm:$0xff]  ;;  %v654_v30 = vld [vmem:[%s4809_s6 + $0x380] sm:$0xff] }
  0x3e   : > { %3127 = vmatprep.subr.bf16.mxu1 %v3126_v13  ;;  %v587_v13 = vld [vmem:[%s4809_s6 + $0x168] sm:$0xff]  ;;  %v3178_v43 = vpack.c.bf16 %v629_v10, %v628_v9  ;;  %v613_v20 = vld [vmem:[%s4809_s6 + $0x238] sm:$0xff]  ;;  %v588_v27 = vld [vmem:[%s4809_s6 + $0x170] sm:$0xff] }
  0x3f   : > { %3141 = vmatpush3.bf16.msra.mxu0 %v3140_v16  ;;  %v604_v16 = vld [vmem:[%s4809_s6 + $0x1f0] sm:$0xff]  ;;  %v3160_v22 = vpack.c.bf16 %v587_v13, %v586_v12  ;;  %v589_v28 = vld [vmem:[%s4809_s6 + $0x178] sm:$0xff]  ;;  %v655_v31 = vld [vmem:[%s4809_s6 + $0x388] sm:$0xff] }
  0x40   : > { %3143 = vmatprep.subr.bf16.mxu0 %v3142_v19  ;;  %v612_v19 = vld [vmem:[%s4809_s6 + $0x230] sm:$0xff]  ;;  %v614_v33 = vld [vmem:[%s4809_s6 + $0x240] sm:$0xff]  ;;  %v615_v34 = vld [vmem:[%s4809_s6 + $0x248] sm:$0xff]  ;;  %v3198_v40 = vpack.c.bf16 %v655_v31, %v654_v30 }
  0x41   : > { %3129 = vmatpush3.bf16.msra.mxu1 %v3128_v23  ;;  %v630_v23 = vld [vmem:[%s4809_s6 + $0x2c0] sm:$0xff]  ;;  %v632_v36 = vld [vmem:[%s4809_s6 + $0x2d0] sm:$0xff]  ;;  %v633_v37 = vld [vmem:[%s4809_s6 + $0x2d8] sm:$0xff]  ;;  %v3184_v44 = vpack.c.bf16 %v615_v34, %v614_v33 }
  0x42   : > { %3131 = vmatprep.subr.bf16.mxu1 %v3130_v26  ;;  %v3162_v26 = vpack.c.bf16 %v605_v17, %v604_v16  ;;  %v638_v41 = vld [vmem:[%s4809_s6 + $0x300] sm:$0xff]  ;;  %v656_v45 = vld [vmem:[%s4809_s6 + $0x390] sm:$0xff]  ;;  %v3186_v47 = vpack.c.bf16 %v633_v37, %v632_v36  ;;  %v641_v57 = vld [vmem:[%s4809_s6 + $0x318] sm:$0xff] }
  0x43   : > { %3145 = vmatpush3.bf16.msra.mxu0 %v3144_v29  ;;  %v3180_v29 = vpack.c.bf16 %v613_v20, %v612_v19  ;;  %v616_v49 = vld [vmem:[%s4809_s6 + $0x250] sm:$0xff]  ;;  %v634_v52 = vld [vmem:[%s4809_s6 + $0x2e0] sm:$0xff]  ;;  %v659_v61 = vld [vmem:[%s4809_s6 + $0x3a8] sm:$0xff] }
  0x44   : > { %3147 = vmatprep.subr.bf16.mxu0 %v3146_v32  ;;  %v3182_v32 = vpack.c.bf16 %v631_v24, %v630_v23  ;;  %v636_v1 = vld [vmem:[%s4809_s6 + $0x2f0] sm:$0xff]  ;;  %v642_v3 = vld [vmem:[%s4809_s6 + $0x320] sm:$0xff]  ;;  %v643_v5 = vld [vmem:[%s4809_s6 + $0x328] sm:$0xff] }
  0x45   : > { %3133 = vmatpush3.bf16.msra.mxu1 %v3132_v35  ;;  %v3164_v35 = vpack.c.bf16 %v589_v28, %v588_v27  ;;  %v660_v9 = vld [vmem:[%s4809_s6 + $0x3b0] sm:$0xff]  ;;  %v661_v10 = vld [vmem:[%s4809_s6 + $0x3b8] sm:$0xff]  ;;  %v662_v19 = vld [vmem:[%s4809_s6 + $0x3c0] sm:$0xff] }
  0x46   : > { %3167 = vmatprep.subr.bf16.mxu1 %v3166_v39  ;;  %v4020_v39 = vrot.slane %v924_v25, %v3660_v38  ;;  %v620_v12 = vld [vmem:[%s4809_s6 + $0x270] sm:$0xff]  ;;  %v621_v13 = vld [vmem:[%s4809_s6 + $0x278] sm:$0xff]  ;;  %v663_v20 = vld [vmem:[%s4809_s6 + $0x3c8] sm:$0xff] }
  0x47   : > { %3149 = vmatpush3.bf16.msra.mxu0 %v3148_v42  ;;  %v639_v42 = vld [vmem:[%s4809_s6 + $0x308] sm:$0xff]  ;;  %v644_v16 = vld [vmem:[%s4809_s6 + $0x330] sm:$0xff]  ;;  %v645_v17 = vld [vmem:[%s4809_s6 + $0x338] sm:$0xff] }
  0x48   : > { %1030 = vmatmul.mubr.f32.vlgmr.msra.gmra.mrb[2].mxu1 %v3822_v59  ;;  %3151 = vmatprep.subr.bf16.mxu0 %v3150_v46  ;;  %v603_v59 = vld [vmem:[%s4809_s6 + $0x1e8] sm:$0xff]  ;;  %v657_v46 = vld [vmem:[%s4809_s6 + $0x398] sm:$0xff]  ;;  %v3200_v51 = vpack.c.bf16 %v639_v42, %v638_v41  ;;  %v940_v54 = vcombine.high %v4020_v39, %v4020_v39  ;;  %v3212_v24 = vpack.c.bf16 %v645_v17, %v644_v16  ;;  %v646_v25 = vld [vmem:[%s4809_s6 + $0x340] sm:$0xff] }
  0x49   : > { %3169 = vmatpush3.bf16.msra.mxu1 %v3168_v50  ;;  %v3158_v11 = vpack.c.bf16 %v603_v59, %v602_v0  ;;  %1169 = vmatprep.mubr.f32.mxu1 %v939_v14  ;;  %v617_v50 = vld [vmem:[%s4809_s6 + $0x258] sm:$0xff]  ;;  %v3202_v55 = vpack.c.bf16 %v657_v46, %v656_v45  ;;  %v619_v0 = vld [vmem:[%s4809_s6 + $0x268] sm:$0xff]  ;;  %v3208_v14 = vpack.c.bf16 %v643_v5, %v642_v3  ;;  %v664_v31 = vld [vmem:[%s4809_s6 + $0x3d0] sm:$0xff] }
  0x4a   : > { %3171 = vmatprep.subr.bf16.mxu1 %v3170_v53  ;;  %v635_v53 = vld [vmem:[%s4809_s6 + $0x2e8] sm:$0xff]  ;;  %v3188_v58 = vpack.c.bf16 %v617_v50, %v616_v49  ;;  %v672_v33 = vld [vmem:[%s4809_s6 + $0x410] sm:$0xff]  ;;  %v673_v34 = vld [vmem:[%s4809_s6 + $0x418] sm:$0xff] }
  0x4b   : > { %3153 = vmatpush3.bf16.msra.mxu0 %v3152_v56  ;;  %v640_v56 = vld [vmem:[%s4809_s6 + $0x310] sm:$0xff]  ;;  %v3190_v62 = vpack.c.bf16 %v635_v53, %v634_v52  ;;  %v671_v23 = vld [vmem:[%s4809_s6 + $0x408] sm:$0xff]  ;;  %v649_v42 = vld [vmem:[%s4809_s6 + $0x358] sm:$0xff] }
  0x4c   : > { %3155 = vmatprep.subr.bf16.mxu0 %v3154_v60  ;;  %v658_v60 = vld [vmem:[%s4809_s6 + $0x3a0] sm:$0xff]  ;;  %v3204_v59 = vpack.c.bf16 %v641_v57, %v640_v56  ;;  %v647_v27 = vld [vmem:[%s4809_s6 + $0x348] sm:$0xff]  ;;  %v648_v41 = vld [vmem:[%s4809_s6 + $0x350] sm:$0xff] }
  0x4d   : > { %3173 = vmatpush3.bf16.msra.mxu1 %v3172_v63  ;;  %v618_v63 = vld [vmem:[%s4809_s6 + $0x260] sm:$0xff]  ;;  %v3216_v36 = vpack.c.bf16 %v647_v27, %v646_v25  ;;  %v3220_v49 = vpack.c.bf16 %v649_v42, %v648_v41  ;;  %v651_v52 = vld [vmem:[%s4809_s6 + $0x368] sm:$0xff]  ;;  %v676_v56 = vld [vmem:[%s4809_s6 + $0x430] sm:$0xff] }
  0x4e   : > { %3175 = vmatprep.subr.bf16.mxu1 %v3174_v2  ;;  %v3206_v2 = vpack.c.bf16 %v659_v61, %v658_v60  ;;  %v4115_v28 = vld [vmem:[#allocation2 + $0x6] sm:$0x3f]  ;;  %v677_v57 = vld [vmem:[%s4809_s6 + $0x438] sm:$0xff]  ;;  %v652_v61 = vld [vmem:[%s4809_s6 + $0x370] sm:$0xff] }
  0x4f   : > { %3157 = vmatpush3.bf16.msra.mxu0 %v3156_v7  ;;  %v3192_v7 = vpack.c.bf16 %v619_v0, %v618_v63  ;;  %v666_v45 = vld [vmem:[%s4809_s6 + $0x3e0] sm:$0xff]  ;;  %v3240_v63 = vpack.c.bf16 %v677_v57, %v676_v56  ;;  %v2555_v0 = vld [vmem:[%s4808_s5 + $0x1b8] sm:$0xff]  ;;  %v4198_v3 = vrot.slane %v4115_v28, %v3660_v38  ;;  %v683_v25 = vld [vmem:[%s4809_s6 + $0x468] sm:$0xff] }
  0x50   : > { %3159 = vmatprep.subr.bf16.mxu0 %v3158_v11  ;;  %v674_v46 = vld [vmem:[%s4809_s6 + $0x420] sm:$0xff]  ;;  %v2546_v41 = vld [vmem:[%s4808_s5 + $0x170] sm:$0xff]  ;;  %v689_v56 = vld [vmem:[%s4809_s6 + $0x498] sm:$0xff] }
  0x51   : > { %3177 = vmatpush3.bf16.msra.mxu1 %v3176_v15  ;;  %v3210_v15 = vpack.c.bf16 %v661_v10, %v660_v9  ;;  %v2540_v9 = vld [vmem:[%s4808_s5 + $0x140] sm:$0xff]  ;;  %v1373_v16 = vcombine.high %v4198_v3, %v4198_v3  ;;  %vm3271_vm0 = vmpackc.low %vm961_vm14, %vm3477_vm15 }
  0x52   : > { %3179 = vmatprep.subr.bf16.mxu1 %v3178_v43  ;;  %v3196_v43 = vpack.c.bf16 %v621_v13, %v620_v12  ;;  %v2558_v12 = vld [vmem:[%s4808_s5 + $0x1d0] sm:$0xff] }
  0x53   : > { %3161 = vmatpush3.bf16.msra.mxu0 %v3160_v22  ;;  %v670_v22 = vld [vmem:[%s4809_s6 + $0x400] sm:$0xff]  ;;  %v680_v13 = vld [vmem:[%s4809_s6 + $0x450] sm:$0xff] }
  0x54   : > { %3163 = vmatprep.subr.bf16.mxu0 %v3162_v26  ;;  %v3214_v26 = vpack.c.bf16 %v663_v20, %v662_v19  ;;  %v3231_v30 = vpack.c.bf16 %v671_v23, %v670_v22  ;;  %v2542_v19 = vld [vmem:[%s4808_s5 + $0x150] sm:$0xff]  ;;  %v2559_v22 = vld [vmem:[%s4808_s5 + $0x1d8] sm:$0xff]  ;;  %v2560_v23 = vld [vmem:[%s4808_s5 + $0x1e0] sm:$0xff] }
  0x55   : > { %3181 = vmatpush3.bf16.msra.mxu1 %v3180_v29  ;;  %v2467_v29 = vld [vmem:[#allocation2 + $0xc] sm:$0x3f]  ;;  %v3281_v27 = vpack.c.bf16 %v2560_v23, %v2559_v22  ;;  %v2571_v23 = vld [vmem:[%s4808_s5 + $0x238] sm:$0xff] }
  0x56   : > { %3183 = vmatprep.subr.bf16.mxu1 %v3182_v32  ;;  %v665_v32 = vld [vmem:[%s4809_s6 + $0x3d8] sm:$0xff]  ;;  %2468 = vst.msk [vmem:[#allocation2 + $0x6] sm:$0x3f] %vm3673_vm10, %v2467_v29 }
  0x57   : > { %3165 = vmatpush3.bf16.msra.mxu0 %v3164_v35  ;;  %v4133_v35 = vld.sshfl [vmem:[%s3574_s29 + $0x10] sm:$0x33 pattern:$0x76325410]  ;;  %v2543_v29 = vld [vmem:[%s4808_s5 + $0x158] sm:$0xff] }
  0x58   : > { %3199 = vmatprep.subr.bf16.mxu0 %v3198_v40  ;;  %v948_v37 = vcombine.high %v4133_v35, %v4133_v35  ;;  %v3218_v40 = vpack.c.bf16 %v665_v32, %v664_v31  ;;  %v2561_v31 = vld [vmem:[%s4808_s5 + $0x1e8] sm:$0xff]  ;;  %v2562_v32 = vld [vmem:[%s4808_s5 + $0x1f0] sm:$0xff] }
  0x59   : > { %3185 = vmatpush3.bf16.msra.mxu1 %v3184_v44  ;;  %v3234_v44 = vpack.c.bf16 %v673_v34, %v672_v33  ;;  %v684_v33 = vld [vmem:[%s4809_s6 + $0x470] sm:$0xff]  ;;  %v685_v34 = vld [vmem:[%s4809_s6 + $0x478] sm:$0xff] }
  0x5a   : > { %1100 = vmatmul.mubr.f32.vlgmr.msra.gmra.mrb[2].mxu0 %v3839_v4  ;;  %3187 = vmatprep.subr.bf16.mxu1 %v3186_v47  ;;  %v637_v4 = vld [vmem:[%s4809_s6 + $0x2f8] sm:$0xff]  ;;  %v675_v47 = vld [vmem:[%s4809_s6 + $0x428] sm:$0xff]  ;;  %v3252_v42 = vpack.c.bf16 %v685_v34, %v684_v33  ;;  %v2574_v33 = vld [vmem:[%s4808_s5 + $0x250] sm:$0xff] }
  0x5b   : > { %3201 = vmatpush3.bf16.msra.mxu0 %v3200_v51  ;;  %1239 = vmatprep.mubr.f32.mxu0 %v940_v54  ;;  %v3194_v11 = vpack.c.bf16 %v637_v4, %v636_v1  ;;  %v650_v51 = vld [vmem:[%s4809_s6 + $0x360] sm:$0xff]  ;;  %v3237_v53 = vpack.c.bf16 %v675_v47, %v674_v46  ;;  %v668_v54 = vld [vmem:[%s4809_s6 + $0x3f0] sm:$0xff]  ;;  %v679_v4 = vld [vmem:[%s4809_s6 + $0x448] sm:$0xff] }
  0x5c   : > { %3203 = vmatprep.subr.bf16.mxu0 %v3202_v55  ;;  %v669_v55 = vld [vmem:[%s4809_s6 + $0x3f8] sm:$0xff]  ;;  %v678_v1 = vld [vmem:[%s4809_s6 + $0x440] sm:$0xff]  ;;  %v687_v46 = vld [vmem:[%s4809_s6 + $0x488] sm:$0xff] }
  0x5d   : > { %3189 = vmatpush3.bf16.msra.mxu1 %v3188_v58  ;;  %v3224_v58 = vpack.c.bf16 %v651_v52, %v650_v51  ;;  %v3226_v60 = vpack.c.bf16 %v669_v55, %v668_v54  ;;  %v3243_v10 = vpack.c.bf16 %v679_v4, %v678_v1  ;;  %v2548_v51 = vld [vmem:[%s4808_s5 + $0x180] sm:$0xff]  ;;  %v2566_v54 = vld [vmem:[%s4808_s5 + $0x210] sm:$0xff]  ;;  %v691_v1 = vld [vmem:[%s4809_s6 + $0x4a8] sm:$0xff] }
  0x5e   : > { %3191 = vmatprep.subr.bf16.mxu1 %v3190_v62  ;;  %v653_v62 = vld [vmem:[%s4809_s6 + $0x378] sm:$0xff]  ;;  %v688_v55 = vld [vmem:[%s4809_s6 + $0x490] sm:$0xff] }
  0x5f   : > { %3205 = vmatpush3.bf16.msra.mxu0 %v3204_v59  ;;  %v2556_v59 = vld [vmem:[%s4808_s5 + $0x1c0] sm:$0xff] }
  0x60   : > { %3207 = vmatprep.subr.bf16.mxu0 %v3206_v2  ;;  %v3228_v2 = vpack.c.bf16 %v653_v62, %v652_v61  ;;  %v3273_v5 = vpack.c.bf16 %v2556_v59, %v2555_v0  ;;  %v2550_v61 = vld [vmem:[%s4808_s5 + $0x190] sm:$0xff]  ;;  %v3258_v62 = vpack.c.bf16 %v689_v56, %v688_v55  ;;  %v2568_v0 = vld [vmem:[%s4808_s5 + $0x220] sm:$0xff]  ;;  %v1358_v55 = vcombine.high %v4115_v28, %v4115_v28 }
  0x61   : > { %3193 = vmatpush3.bf16.msra.mxu1 %v3192_v7  ;;  %v2539_v7 = vld [vmem:[%s4808_s5 + $0x138] sm:$0xff]  ;;  %v690_v59 = vld [vmem:[%s4809_s6 + $0x4a0] sm:$0xff]  ;;  %v2612_v28 = vld [vmem:[%s4808_s5 + $0x370] sm:$0xff] }
  0x62   : > { %3195 = vmatprep.subr.bf16.mxu1 %v3194_v11  ;;  %v2557_v11 = vld [vmem:[%s4808_s5 + $0x1c8] sm:$0xff] }
  0x63   : > { %3209 = vmatpush3.bf16.msra.mxu0 %v3208_v14  ;;  %v681_v14 = vld [vmem:[%s4809_s6 + $0x458] sm:$0xff]  ;;  %v3277_v17 = vpack.c.bf16 %v2558_v12, %v2557_v11  ;;  %v2570_v11 = vld [vmem:[%s4808_s5 + $0x230] sm:$0xff] }
  0x64   : > { %3211 = vmatprep.subr.bf16.mxu0 %v3210_v15  ;;  %v3275_v15 = vpack.c.bf16 %v2540_v9, %v2539_v7  ;;  %v3246_v20 = vpack.c.bf16 %v681_v14, %v680_v13  ;;  %v2552_v7 = vld [vmem:[%s4808_s5 + $0x1a0] sm:$0xff]  ;;  %v3261_v9 = vpack.c.bf16 %v691_v1, %v690_v59  ;;  %v692_v12 = vld [vmem:[%s4809_s6 + $0x4b0] sm:$0xff]  ;;  %v693_v13 = vld [vmem:[%s4809_s6 + $0x4b8] sm:$0xff] }
  0x65   : > { %3197 = vmatpush3.bf16.msra.mxu1 %v3196_v43  ;;  %v2541_v43 = vld [vmem:[%s4808_s5 + $0x148] sm:$0xff]  ;;  %v2586_v1 = vld [vmem:[%s4808_s5 + $0x2a0] sm:$0xff] }
  0x66   : > { %3230 = vmatprep.subr.bf16.mxu1 %v3473_v8 }
  0x67   : > { %3213 = vmatpush3.bf16.msra.mxu0 %v3212_v24  ;;  %v682_v24 = vld [vmem:[%s4809_s6 + $0x460] sm:$0xff] }
  0x68   : > { %1170 = vmatmul.mubr.f32.vlgmr.msra.gmra.mrb[4].mxu1 %v3961_v6  ;;  %3215 = vmatprep.subr.bf16.mxu0 %v3214_v26  ;;  %v667_v6 = vld [vmem:[%s4809_s6 + $0x3e8] sm:$0xff]  ;;  %v3279_v26 = vpack.c.bf16 %v2542_v19, %v2541_v43  ;;  %v3264_v43 = vpack.c.bf16 %v693_v13, %v692_v12  ;;  %v694_v19 = vld [vmem:[%s4809_s6 + $0x4c0] sm:$0xff]  ;;  %v2588_v13 = vld [vmem:[%s4808_s5 + $0x2b0] sm:$0xff] }
  0x69   : > { %3232 = vmatpush1.bf16.msra.mxu1 %v3231_v30  ;;  %2538 = vmatprep.mubr.msk.f32.mxu1 %vm958_vm13, %v948_v37  ;;  %v3222_v50 = vpack.c.bf16 %v667_v6, %v666_v45  ;;  %v3249_v30 = vpack.c.bf16 %v683_v25, %v682_v24  ;;  %v3285_v37 = vpack.c.bf16 %v2562_v32, %v2561_v31  ;;  %v2564_v45 = vld [vmem:[%s4808_s5 + $0x200] sm:$0xff]  ;;  %v2597_v31 = vld [vmem:[%s4808_s5 + $0x2f8] sm:$0xff]  ;;  %v2573_v32 = vld [vmem:[%s4808_s5 + $0x248] sm:$0xff] }
  0x6a   : > { %3233 = vmatprep.subr.bf16.mxu1 %v3473_v8  ;;  %v686_v6 = vld [vmem:[%s4809_s6 + $0x480] sm:$0xff] }
  0x6b   : > { %3217 = vmatpush3.bf16.msra.mxu0 %v3216_v36  ;;  %v3255_v52 = vpack.c.bf16 %v687_v46, %v686_v6  ;;  %v2572_v24 = vld [vmem:[%s4808_s5 + $0x240] sm:$0xff] }
  0x6c   : > { %3219 = vmatprep.subr.bf16.mxu0 %v3218_v40  ;;  %v2545_v40 = vld [vmem:[%s4808_s5 + $0x168] sm:$0xff]  ;;  %v2576_v6 = vld [vmem:[%s4808_s5 + $0x260] sm:$0xff] }
  0x6d   : > { %3235 = vmatpush1.bf16.msra.mxu1 %v3234_v44  ;;  %v2563_v44 = vld [vmem:[%s4808_s5 + $0x1f8] sm:$0xff]  ;;  %v3287_v47 = vpack.c.bf16 %v2546_v41, %v2545_v40  ;;  %v2580_v40 = vld [vmem:[%s4808_s5 + $0x270] sm:$0xff] }
  0x6e   : > { %3236 = vmatprep.subr.bf16.mxu1 %v3473_v8  ;;  %v2581_v41 = vld [vmem:[%s4808_s5 + $0x278] sm:$0xff] }
  0x6f   : > { %3221 = vmatpush3.bf16.msra.mxu0 %v3220_v49  ;;  %v3289_v49 = vpack.c.bf16 %v2564_v45, %v2563_v44  ;;  %v2598_v44 = vld [vmem:[%s4808_s5 + $0x300] sm:$0xff]  ;;  %v2575_v45 = vld [vmem:[%s4808_s5 + $0x258] sm:$0xff]  ;;  %v3316_v46 = vpack.c.bf16 %v2581_v41, %v2580_v40  ;;  %v2611_v41 = vld [vmem:[%s4808_s5 + $0x368] sm:$0xff] }
  0x70   : > { %3223 = vmatprep.subr.bf16.mxu0 %v3222_v50  ;;  %v2547_v50 = vld [vmem:[%s4808_s5 + $0x178] sm:$0xff]  ;;  %v2610_v40 = vld [vmem:[%s4808_s5 + $0x360] sm:$0xff] }
  0x71   : > { %3238 = vmatpush1.bf16.msra.mxu1 %v3237_v53  ;;  %v2565_v53 = vld [vmem:[%s4808_s5 + $0x208] sm:$0xff]  ;;  %v3291_v57 = vpack.c.bf16 %v2548_v51, %v2547_v50  ;;  %v2582_v50 = vld [vmem:[%s4808_s5 + $0x280] sm:$0xff] }
  0x72   : > { %3239 = vmatprep.subr.bf16.mxu1 %v3473_v8  ;;  %v2583_v51 = vld [vmem:[%s4808_s5 + $0x288] sm:$0xff] }
  0x73   : > { %3225 = vmatpush3.bf16.msra.mxu0 %v3224_v58  ;;  %v3293_v58 = vpack.c.bf16 %v2566_v54, %v2565_v53  ;;  %v2600_v53 = vld [vmem:[%s4808_s5 + $0x310] sm:$0xff]  ;;  %v2601_v54 = vld [vmem:[%s4808_s5 + $0x318] sm:$0xff]  ;;  %v3320_v56 = vpack.c.bf16 %v2583_v51, %v2582_v50 }
  0x74   : > { %3227 = vmatprep.subr.bf16.mxu0 %v3226_v60  ;;  %v2549_v60 = vld [vmem:[%s4808_s5 + $0x188] sm:$0xff] }
  0x75   : > { %3241 = vmatpush1.bf16.msra.mxu1 %v3240_v63  ;;  %v2567_v63 = vld [vmem:[%s4808_s5 + $0x218] sm:$0xff]  ;;  %v3295_v4 = vpack.c.bf16 %v2550_v61, %v2549_v60  ;;  %v2602_v61 = vld [vmem:[%s4808_s5 + $0x320] sm:$0xff] }
  0x76   : > { %3242 = vmatprep.subr.bf16.mxu1 %v3473_v8  ;;  %v2585_v60 = vld [vmem:[%s4808_s5 + $0x298] sm:$0xff] }
  0x77   : > { %3229 = vmatpush3.bf16.msra.mxu0 %v3228_v2  ;;  %v3297_v2 = vpack.c.bf16 %v2568_v0, %v2567_v63  ;;  %v2577_v63 = vld [vmem:[%s4808_s5 + $0x268] sm:$0x7f]  ;;  %v1372_v0 = vrot.slane %v1358_v55, %v3660_v38 }
  0x78   : > { %3274 = vmatprep.subr.bf16.mxu0 %v3273_v5  ;;  %v2551_v5 = vld [vmem:[%s4808_s5 + $0x198] sm:$0xff] }
  0x79   : > { %3244 = vmatpush1.bf16.msra.mxu1 %v3243_v10  ;;  %v2569_v10 = vld [vmem:[%s4808_s5 + $0x228] sm:$0xff]  ;;  %v3299_v14 = vpack.c.bf16 %v2552_v7, %v2551_v5  ;;  %v2614_v7 = vld [vmem:[%s4808_s5 + $0x380] sm:$0xff] }
  0x7a   : > { %1240 = vmatmul.mubr.f32.vlgmr.msra.gmra.mrb[4].mxu0 %v4020_v39  ;;  %3245 = vmatprep.subr.bf16.mxu1 %v3473_v8  ;;  %v2544_v39 = vld [vmem:[%s4808_s5 + $0x160] sm:$0xff]  ;;  %v2587_v5 = vld [vmem:[%s4808_s5 + $0x2a8] sm:$0xff] }
  0x7b   : > { %3276 = vmatpush3.bf16.msra.mxu0 %v3275_v15  ;;  %1445 = vmatprep.mubr.f32.mxu0 %v1373_v16  ;;  %v3283_v36 = vpack.c.bf16 %v2544_v39, %v2543_v29  ;;  %v3301_v15 = vpack.c.bf16 %v2570_v11, %v2569_v10  ;;  %v2553_v16 = vld [vmem:[%s4808_s5 + $0x1a8] sm:$0xff]  ;;  %v3306_v39 = vpack.c.bf16 %v2572_v24, %v2571_v23  ;;  %v2604_v10 = vld [vmem:[%s4808_s5 + $0x330] sm:$0xff]  ;;  %v2605_v11 = vld [vmem:[%s4808_s5 + $0x338] sm:$0xff] }
  0x7c   : > { %3278 = vmatprep.subr.bf16.mxu0 %v3277_v17  ;;  %v2554_v17 = vld [vmem:[%s4808_s5 + $0x1b0] sm:$0xff]  ;;  %v3328_v12 = vpack.c.bf16 %v2587_v5, %v2586_v1 }
  0x7d   : > { %3247 = vmatpush1.bf16.msra.mxu1 %v3246_v20  ;;  %v695_v20 = vld [vmem:[%s4809_s6 + $0x4c8] sm:$0xff]  ;;  %v3303_v22 = vpack.c.bf16 %v2554_v17, %v2553_v16  ;;  %v2589_v16 = vld [vmem:[%s4808_s5 + $0x2b8] sm:$0xff]  ;;  %v2616_v17 = vld [vmem:[%s4808_s5 + $0x390] sm:$0xff] }
  0x7e   : > { %3248 = vmatprep.subr.bf16.mxu1 %v3473_v8  ;;  %v3267_v25 = vpack.c.bf16 %v695_v20, %v694_v19  ;;  %v4362_v29 = vld [vmem:[#allocation2 + $0xc] sm:$0x3f]  ;;  %v2606_v19 = vld [vmem:[%s4808_s5 + $0x340] sm:$0xff] }
  0x7f   : > { %3280 = vmatpush3.bf16.msra.mxu0 %v3279_v26  ;;  %v696_v26 = vld [vmem:[%s4809_s6 + $0x4d0] sm:$0xff]  ;;  %v2607_v20 = vld [vmem:[%s4808_s5 + $0x348] sm:$0xff] }
  0x80   : > { %3282 = vmatprep.subr.bf16.mxu0 %v3281_v27  ;;  %v697_v27 = vld [vmem:[%s4809_s6 + $0x4d8] sm:$0xf]  ;;  %v3334_v24 = vpack.c.bf16 %v2607_v20, %v2606_v19 }
  0x81   : > { %3250 = vmatpush1.bf16.msra.mxu1 %v3249_v30  ;;  %v2596_v30 = vld [vmem:[%s4808_s5 + $0x2f0] sm:$0xff]  ;;  %v3270_v34 = vpack.c.bf16 %v697_v27, %v696_v26  ;;  %v2591_v26 = vld [vmem:[%s4808_s5 + $0x2c8] sm:$0xff]  ;;  %v1565_v27 = vcombine.high %v4362_v29, %v4362_v29 }
  0x82   : > { %3251 = vmatprep.subr.bf16.mxu1 %v3473_v8 }
  0x83   : > { %3284 = vmatpush3.bf16.msra.mxu0 %v3283_v36  ;;  %v4379_v36 = vrot.slane %v4362_v29, %v3660_v38  ;;  %v2593_v29 = vld [vmem:[%s4808_s5 + $0x2d8] sm:$0xff] }
  0x84   : > { %3286 = vmatprep.subr.bf16.mxu0 %v3285_v37  ;;  %v3314_v37 = vpack.c.bf16 %v2597_v31, %v2596_v30  ;;  %v2609_v30 = vld [vmem:[%s4808_s5 + $0x358] sm:$0xff] }
  0x85   : > { %3253 = vmatpush1.bf16.msra.mxu1 %v3252_v42  ;;  %v3309_v42 = vpack.c.bf16 %v2574_v33, %v2573_v32  ;;  %v2592_v33 = vld [vmem:[%s4808_s5 + $0x2d0] sm:$0xff] }
  0x86   : > { %3254 = vmatprep.subr.bf16.mxu1 %v3473_v8 }
  0x87   : > { %3288 = vmatpush3.bf16.msra.mxu0 %v3287_v47  ;;  %v1580_v47 = vcombine.high %v4379_v36, %v4379_v36 }
  0x88   : > { %3290 = vmatprep.subr.bf16.mxu0 %v3289_v49 }
  0x89   : > { %3256 = vmatpush1.bf16.msra.mxu1 %v3255_v52  ;;  %v3312_v52 = vpack.c.bf16 %v2576_v6, %v2575_v45  ;;  %v2595_v45 = vld [vmem:[%s4808_s5 + $0x2e8] sm:$0xff] }
  0x8a   : > { %3257 = vmatprep.subr.bf16.mxu1 %v3473_v8 }
  0x8b   : > { %3292 = vmatpush3.bf16.msra.mxu0 %v3291_v57  ;;  %v2584_v57 = vld [vmem:[%s4808_s5 + $0x290] sm:$0xff] }
  0x8c   : > { %3294 = vmatprep.subr.bf16.mxu0 %v3293_v58  ;;  %v3322_v58 = vpack.c.bf16 %v2601_v54, %v2600_v53  ;;  %v3324_v59 = vpack.c.bf16 %v2585_v60, %v2584_v57  ;;  %v1738_v53 = vld [vmem:[%s4811_s8] sm:$0xff]  ;;  %v1739_v54 = vld [vmem:[%s4811_s8 + $0x8] sm:$0xff] }
  0x8d   : > { %3259 = vmatpush1.bf16.msra.mxu1 %v3258_v62  ;;  %v2603_v62 = vld [vmem:[%s4808_s5 + $0x328] sm:$0xff]  ;;  %v3356_v55 = vpack.c.bf16 %v1739_v54, %v1738_v53  ;;  %v2017_v54 = vld [vmem:[%s4815_s12 + $0x80] sm:$0xff] }
  0x8e   : > { %3260 = vmatprep.subr.bf16.mxu1 %v3473_v8 }
  0x8f   : > { %3296 = vmatpush3.bf16.msra.mxu0 %v3295_v4 }
  0x90   : > { %3298 = vmatprep.subr.bf16.mxu0 %v3297_v2  ;;  %v3326_v2 = vpack.c.bf16 %v2603_v62, %v2602_v61  ;;  %v1825_v61 = vld [vmem:[%s4813_s10 + $0x8] sm:$0xff]  ;;  %v1828_v62 = vld [vmem:[%s4813_s10 + $0x20] sm:$0xff] }
  0x91   : > { %3262 = vmatpush1.bf16.msra.mxu1 %v3261_v9  ;;  %v2615_v9 = vld [vmem:[%s4808_s5 + $0x388] sm:$0xff] }
  0x92   : > { %3263 = vmatprep.subr.bf16.mxu1 %v3473_v8 }
  0x93   : > { %3300 = vmatpush3.bf16.msra.mxu0 %v3299_v14  ;;  %v3350_v14 = vpack.c.bf16 %v2615_v9, %v2614_v7 }
  0x94   : > { %3302 = vmatprep.subr.bf16.mxu0 %v3301_v15  ;;  %v3330_v15 = vpack.c.bf16 %v2605_v11, %v2604_v10 }
  0x95   : > { %3265 = vmatpush1.bf16.msra.mxu1 %v3264_v43  ;;  %v2617_v43 = vld [vmem:[%s4808_s5 + $0x398] sm:$0xff] }
  0x96   : > { %3266 = vmatprep.subr.bf16.mxu1 %v3473_v8  ;;  %v3353_v23 = vpack.c.bf16 %v2617_v43, %v2616_v17 }
  0x97   : > { %3304 = vmatpush3.bf16.msra.mxu0 %v3303_v22  ;;  %v3332_v22 = vpack.c.bf16 %v2589_v16, %v2588_v13 }
  0x98   : > { %3305 = vmatprep.subr.bf16.mxu0 %v3473_v8 }
  0x99   : > { %3268 = vmatpush1.bf16.msra.mxu1 %v3267_v25  ;;  %v2590_v25 = vld [vmem:[%s4808_s5 + $0x2c0] sm:$0xff] }
  0x9a   : > { %3269 = vmatprep.subr.bf16.mxu1 %v3473_v8  ;;  %1446 = vmatmul.mubr.f32.vlgmr.msra.gmra.mrb[6].mxu0 %v4198_v3  ;;  %v2599_v3 = vld [vmem:[%s4808_s5 + $0x308] sm:$0xff]  ;;  %v3336_v31 = vpack.c.bf16 %v2591_v26, %v2590_v25 }
  0x9b   : > { %3307 = vmatpush3.bf16.msra.mxu0 %v3306_v39  ;;  %2991 = vmatprep.mubr.msk.f32.mxu0 %vm3474_vm5, %v3475_v18  ;;  %v3318_v49 = vpack.c.bf16 %v2599_v3, %v2598_v44  ;;  %v2608_v39 = vld [vmem:[%s4808_s5 + $0x350] sm:$0xff]  ;;  %v3342_v44 = vpack.c.bf16 %v2611_v41, %v2610_v40  ;;  %v2594_v3 = vld [vmem:[%s4808_s5 + $0x2e0] sm:$0xff]  ;;  %v1827_v41 = vld [vmem:[%s4813_s10 + $0x18] sm:$0xff] }
  0x9c   : > { %3308 = vmatprep.subr.bf16.mxu0 %v3473_v8  ;;  %v3338_v32 = vpack.c.bf16 %v2609_v30, %v2608_v39  ;;  %v3344_v6 = vpack.c.bf16 %v2595_v45, %v2594_v3  ;;  %v1824_v40 = vld [vmem:[%s4813_s10] sm:$0xff]  ;;  %v1831_v45 = vld [vmem:[%s4813_s10 + $0x38] sm:$0xff] }
  0x9d   : > { %3272 = vmatpush1.bf16.msk.msra.mxu1 %vm3271_vm0, %v3270_v34  ;;  %v2618_v34 = vld [vmem:[%s4808_s5 + $0x3a0] sm:$0x7f] }
  0x9e   : > { %3315 = vmatprep.subr.bf16.mxu1 %v3314_v37  ;;  %v1579_v37 = vrot.slane %v1565_v27, %v3660_v38 }
  0x9f   : > { %3310 = vmatpush3.bf16.msra.mxu0 %v3309_v42  ;;  %v3340_v42 = vpack.c.bf16 %v2593_v29, %v2592_v33 }
  0xa0   : > { %1310 = vmatmul.mubr.f32.vlgmr.msra.gmra.mrb[6].mxu1 %v4133_v35  ;;  %3311 = vmatprep.subr.bf16.mxu0 %v3473_v8  ;;  %v2613_v35 = vld [vmem:[%s4808_s5 + $0x378] sm:$0xff] }
  0xa1   : > { %3317 = vmatpush3.bf16.msra.mxu1 %v3316_v46  ;;  %1652 = vmatprep.mubr.f32.mxu1 %v1580_v47  ;;  %v3347_v4 = vpack.c.bf16 %v2613_v35, %v2612_v28 }
  0xa2   : > { %3319 = vmatprep.subr.bf16.mxu1 %v3318_v49 }
  0xa3   : > { %3313 = vmatpush3.bf16.msra.mxu0 %v3312_v52 }
  0xa4   : > { %2989 = vmatprep.subr.mxu0 %v3475_v18 }
  0xa5   : > { %3321 = vmatpush3.bf16.msra.mxu1 %v3320_v56  ;;  %v1741_v56 = vld [vmem:[%s4811_s8 + $0x18] sm:$0xff] }
  0xa6   : > { %3323 = vmatprep.subr.bf16.mxu1 %v3322_v58 }
  0xa7   : > { %2990 = vmatpush3.msk.msra.mxu0 %vm760_vm11, %v2577_v63  ;;  %v3361_v63 = vpack.c.bf16 %v1828_v62, %v1825_v61  ;;  %v2019_v62 = vld [vmem:[%s4815_s12 + $0x90] sm:$0xff] }
  0xa8   : > { %2992 = vmatmul.mubr.msk.f32.vlgmr.msra.gmra.mrb[8].mxu0 %vm757_vm12, %v1372_v0  ;;  %3346 = vmatprep.subr.bf16.mxu0 %v3473_v8  ;;  %v1826_v0 = vld [vmem:[%s4813_s10 + $0x10] sm:$0xff] }
  0xa9   : > { %3325 = vmatpush3.bf16.msra.mxu1 %v3324_v59  ;;  %3348 = vmatpush3.bf16.msra.mxu0 %v3347_v4  ;;  %v1829_v59 = vld [vmem:[%s4813_s10 + $0x28] sm:$0xff] }
  0xaa   : > { %3327 = vmatprep.subr.bf16.mxu1 %v3326_v2  ;;  %3349 = vmatprep.subr.bf16.mxu0 %v3473_v8  ;;  %v3370_v1 = vpack.c.bf16 %v1829_v59, %v1826_v0 }
  0xab   : > { %3008 = vmatprep.mubr.msk.f32.mxu0 %vm3474_vm5, %v3475_v18 }
  0xad   : > { %3329 = vmatpush3.bf16.msra.mxu1 %v3328_v12  ;;  %3351 = vmatpush3.bf16.msra.mxu0 %v3350_v14 }
  0xae   : > { %3331 = vmatprep.subr.bf16.mxu1 %v3330_v15  ;;  %3352 = vmatprep.subr.bf16.mxu0 %v3473_v8 }
  0xb1   : > { %3333 = vmatpush3.bf16.msra.mxu1 %v3332_v22  ;;  %3354 = vmatpush3.bf16.msra.mxu0 %v3353_v23 }
  0xb2   : > { %3335 = vmatprep.subr.bf16.mxu1 %v3334_v24  ;;  %3006 = vmatprep.subr.mxu0 %v3475_v18 }
  0xb5   : > { %3337 = vmatpush3.bf16.msra.mxu1 %v3336_v31  ;;  %3007 = vmatpush3.msk.msra.mxu0 %vm760_vm11, %v2618_v34  ;;  %v2621_v34 = vld [vmem:[%s4810_s7] ss:$0 sm:$0xff] }
  0xb6   : > { %3339 = vmatprep.subr.bf16.mxu1 %v3338_v32  ;;  %3009 = vmatmul.mubr.msk.f32.vlgmr.msra.gmra.mrb[10].mxu0 %vm757_vm12, %v1579_v37 }
  0xb7   : > { %3355 = vmatprep.subr.bf16.mxu0 %v3473_v8  ;;  %3019 = vmatprep.mubr.msk.f32.mxu0 %vm3474_vm5, %v3475_v18 }
  0xb8   : > { %3357 = vmatpush3.bf16.msra.mxu0 %v3356_v55  ;;  %v2018_v55 = vld [vmem:[%s4815_s12 + $0x88] sm:$0xff] }
  0xb9   : > { %3341 = vmatpush3.bf16.msra.mxu1 %v3340_v42  ;;  %3358 = vmatprep.subr.bf16.mxu0 %v3473_v8 }
  0xba   : > { %3343 = vmatprep.subr.bf16.mxu1 %v3342_v44  ;;  %v3363_v44 = vpack.c.bf16 %v1827_v41, %v1824_v40  ;;  %v2009_v40 = vld [vmem:[%s4815_s12 + $0x40] sm:$0xff]  ;;  %v2010_v41 = vld [vmem:[%s4815_s12 + $0x48] sm:$0xff] }
  0xbd   : > { %3345 = vmatpush3.bf16.msra.mxu1 %v3344_v6  ;;  %v1834_v6 = vld [vmem:[%s4813_s10 + $0x50] sm:$0xff] }
  0xbe   : > { %3369 = vmatprep.subr.bf16.mxu1 %v3473_v8 }
  0xc0   : > { %1653 = vmatmul.mubr.f32.vlgmr.msra.gmra.mrb[8].mxu1 %v4379_v36  ;;  %v1740_v36 = vld [vmem:[%s4811_s8 + $0x10] sm:$0xff] }
  0xc1   : > { %3030 = vmatprep.mubr.msk.f32.mxu1 %vm3474_vm5, %v3475_v18  ;;  %v3359_v57 = vpack.c.bf16 %v1741_v56, %v1740_v36  ;;  %3371 = vmatpush3.bf16.msra.mxu1 %v3370_v1  ;;  %v3375_v36 = vpack.c.bf16 %v2018_v55, %v2017_v54  ;;  %v2000_v56 = vld [vmem:[#allocation3] sm:$0x3f]  ;;  %v2013_v54 = vld [vmem:[%s4815_s12 + $0x60] sm:$0xff]  ;;  %v2014_v55 = vld [vmem:[%s4815_s12 + $0x68] sm:$0xff] }
  0xc2   : > { %3372 = vmatprep.subr.bf16.mxu1 %v3473_v8  ;;  %v4618_v0 = vrot.slane %v2000_v56, %v3660_v38 }
  0xc3   : > { %3360 = vmatpush3.bf16.msra.mxu0 %v3359_v57  ;;  %v2622_v57 = vld [vmem:[%s4812_s9] ss:$0 sm:$0xff] }
  0xc4   : > { %3362 = vmatprep.subr.bf16.mxu0 %v3361_v63  ;;  %v2020_v63 = vld [vmem:[%s4815_s12 + $0x98] sm:$0xff] }
  0xfa   : > { %v900_v46 = vpop.f32.mrb[0].mxu1 }
  0xfb   : > { %v2976_v47 = vpop.f32.mrb[1].mxu1 }
  0xfc   : > { %v1830_v47 = vld [vmem:[%s4813_s10 + $0x30] sm:$0xff] }
 0x10d   : > { %v2665_v49 = vpop.f32.mrb[0].mxu0 }
 0x10e   : > { %v2666_v50 = vpop.f32.mrb[1].mxu0 }
 0x10f   : > { %v2667_v51 = vadd.f32 %v2666_v50, %v2665_v49  ;;  %v1833_v49 = vld [vmem:[%s4813_s10 + $0x48] sm:$0xff] }
 0x110   : > { %v3367_v50 = vpack.c.bf16 %v1833_v49, %v1830_v47  ;;  %v2011_v47 = vld [vmem:[%s4815_s12 + $0x50] sm:$0xff]  ;;  %v2012_v49 = vld [vmem:[%s4815_s12 + $0x58] sm:$0xff] }
 0x111   : > { %v901_v52 = vadd.f32 %v2667_v51, %v900_v46  ;;  %v3365_v46 = vpack.c.bf16 %v1834_v6, %v1831_v45  ;;  %v1832_v51 = vld [vmem:[%s4813_s10 + $0x40] sm:$0xff]  ;;  %v2028_v45 = vld [vmem:[%s4815_s12 + $0xd8] sm:$0xff]  ;;  %v3393_v6 = vpack.c.bf16 %v2010_v41, %v2009_v40 }
 0x112   : > { %v2224_v40 = vld [vmem:[%s4818_s15] sm:$0x7] }
 0x11b   : > { %v2708_v58 = vpop.f32.mrb[2].mxu1 }
 0x11c   : > { %v2709_v60 = vpop.f32.mrb[3].mxu1 }
 0x11d   : > { %v2710_v28 = vadd.f32 %v2709_v60, %v2708_v58  ;;  %v2001_v58 = vld [vmem:[%s4815_s12] sm:$0xff]  ;;  %v2002_v60 = vld [vmem:[%s4815_s12 + $0x8] sm:$0xff] }
 0x11f   : > { %v1032_v35 = vadd.f32 %v2710_v28, %v901_v52  ;;  %v1835_v52 = vld [vmem:[%s4813_s10 + $0x58] sm:$0xff]  ;;  %v2033_v28 = vld [vmem:[%s4815_s12 + $0x100] sm:$0xff] }
 0x120   : > { %v3373_v53 = vpack.c.bf16 %v1835_v52, %v1832_v51  ;;  %v2030_v51 = vld [vmem:[%s4815_s12 + $0xe8] sm:$0xff]  ;;  %v3397_v52 = vpack.c.bf16 %v2012_v49, %v2011_v47 }
 0x122   : > { %3374 = vmatpush3.bf16.msra.mxu1 %v3373_v53 }
 0x123   : > { %3407 = vmatprep.subr.bf16.mxu1 %v3473_v8 }
 0x12d   : > { %v2743_v4 = vpop.f32.mrb[2].mxu0 }
 0x12e   : > { %v2744_v2 = vpop.f32.mrb[3].mxu0 }
 0x12f   : > { %v2745_v5 = vadd.f32 %v2744_v2, %v2743_v4  ;;  %v3377_v4 = vpack.c.bf16 %v2002_v60, %v2001_v58  ;;  %v2003_v2 = vld [vmem:[%s4815_s12 + $0x10] sm:$0xff] }
 0x130   : > { %v2015_v60 = vld [vmem:[%s4815_s12 + $0x70] sm:$0xff] }
 0x131   : > { %v1102_v7 = vadd.f32 %v2745_v5, %v1032_v35  ;;  %v2034_v35 = vld [vmem:[%s4815_s12 + $0x108] sm:$0xff] }
 0x132   : > { %v3408_v5 = vpack.c.bf16 %v2034_v35, %v2033_v28  ;;  %v2016_v28 = vld [vmem:[%s4815_s12 + $0x78] sm:$0xff] }
 0x133   : > { %v3405_v35 = vpack.c.bf16 %v2016_v28, %v2015_v60 }
 0x13b   : > { %v2778_v9 = vpop.f32.mrb[4].mxu1 }
 0x13c   : > { %v2779_v10 = vpop.f32.mrb[5].mxu1 }
 0x13d   : > { %v2780_v11 = vadd.f32 %v2779_v10, %v2778_v9  ;;  %v3379_v9 = vpack.c.bf16 %v2020_v63, %v2019_v62  ;;  %v2004_v10 = vld [vmem:[%s4815_s12 + $0x18] sm:$0xff]  ;;  %v2216_v62 = vld [vmem:[%s4817_s14 + $0x20] sm:$0xff] }
 0x13f   : > { %v1172_v12 = vadd.f32 %v2780_v11, %v1102_v7  ;;  %v2035_v11 = vld [vmem:[%s4815_s12 + $0x110] sm:$0xff] }
 0x14d   : > { %v2813_v13 = vpop.f32.mrb[4].mxu0 }
 0x14e   : > { %v2814_v14 = vpop.f32.mrb[5].mxu0 }
 0x14f   : > { %v2815_v15 = vadd.f32 %v2814_v14, %v2813_v13  ;;  %v2021_v13 = vld [vmem:[%s4815_s12 + $0xa0] sm:$0xff]  ;;  %v2022_v14 = vld [vmem:[%s4815_s12 + $0xa8] sm:$0xff] }
 0x151   : > { %v1242_v16 = vadd.f32 %v2815_v15, %v1172_v12  ;;  %v2036_v12 = vld [vmem:[%s4815_s12 + $0x118] sm:$0xff]  ;;  %v2063_v15 = vcombine.high %v4618_v0, %v4618_v0 }
 0x16d   : > { %v2848_v17 = vpop.f32.mrb[6].mxu0 }
 0x16e   : > { %v2849_v43 = vpop.f32.mrb[7].mxu0 }
 0x16f   : > { %v2850_v19 = vadd.f32 %v2849_v43, %v2848_v17  ;;  %v2005_v17 = vld [vmem:[%s4815_s12 + $0x20] sm:$0xff]  ;;  %v3411_v43 = vpack.c.bf16 %v2036_v12, %v2035_v11 }
 0x173   : > { %v1311_v20 = vpop.f32.mrb[6].mxu1 }
 0x174   : > { %v1312_v22 = vadd.f32 %v1311_v20, %v1242_v16  ;;  %v1313_v23 = vpop.f32.mrb[7].mxu1  ;;  %v3381_v16 = vpack.c.bf16 %v2004_v10, %v2003_v2  ;;  %v2006_v20 = vld [vmem:[%s4815_s12 + $0x28] sm:$0xff]  ;;  %v2222_v2 = vld [vmem:[%s4817_s14 + $0x50] sm:$0xff] }
 0x175   : > { %v2038_v23 = vld [vmem:[%s4815_s12 + $0x128] sm:$0xff] }
 0x17b   : > { %v1517_v24 = vpop.f32.mrb[8].mxu0 }
 0x17c   : > { %v1518_v25 = vadd.f32 %v2850_v19, %v1517_v24  ;;  %v2993_v26 = vpop.f32.mrb[9].mxu0  ;;  %v3383_v19 = vpack.c.bf16 %v2022_v14, %v2021_v13  ;;  %v2023_v24 = vld [vmem:[%s4815_s12 + $0xb0] sm:$0xff] }
 0x17d   : > { %v3385_v26 = vpack.c.bf16 %v2006_v20, %v2005_v17 }
 0x17e   : > { %v1521_v27 = vadd.f32 %v1518_v25, %v1312_v22  ;;  %v2037_v22 = vld [vmem:[%s4815_s12 + $0x120] sm:$0xff]  ;;  %v2024_v25 = vld [vmem:[%s4815_s12 + $0xb8] sm:$0xff] }
 0x189   : > { %v1724_v39 = vpop.f32.mrb[10].mxu0 }
 0x18a   : > { %v3010_v30 = vpop.f32.mrb[11].mxu0 }
 0x18b   : > { %v2007_v30 = vld [vmem:[%s4815_s12 + $0x30] sm:$0xff] }
 0x193   : > { %v2891_v31 = vpop.f32.mrb[8].mxu1 }
 0x194   : > { %v2892_v32 = vpop.f32.mrb[9].mxu1 }
 0x195   : > { %v2893_v33 = vadd.f32 %v2892_v32, %v2891_v31  ;;  %v2008_v31 = vld [vmem:[%s4815_s12 + $0x38] sm:$0xff]  ;;  %v2048_v32 = vcombine.high %v2000_v56, %v2000_v56 }
 0x196   : > { %v2032_v56 = vld [vmem:[%s4815_s12 + $0xf8] sm:$0xff] }
 0x197   : > { %v1725_v29 = vadd.f32 %v2893_v33, %v1724_v39  ;;  %v3387_v39 = vpack.c.bf16 %v2024_v25, %v2023_v24  ;;  %v2025_v33 = vld [vmem:[%s4815_s12 + $0xc0] sm:$0xff]  ;;  %v2217_v24 = vld [vmem:[%s4817_s14 + $0x28] sm:$0xff] }
 0x199   : > { %v1728_v37 = vadd.f32 %v1725_v29, %v1521_v27  ;;  %v3414_v27 = vpack.c.bf16 %v2038_v23, %v2037_v22  ;;  %v2026_v29 = vld [vmem:[%s4815_s12 + $0xc8] sm:$0xff]  ;;  %v2214_v23 = vld [vmem:[%s4817_s14 + $0x10] sm:$0xff] }
 0x19b   : > { %v1736_v42 = vadd.f32 %v2621_v34, %v1728_v37  ;;  %v3389_v34 = vpack.c.bf16 %v2008_v31, %v2007_v30  ;;  %v3391_v37 = vpack.c.bf16 %v2026_v29, %v2025_v33  ;;  %v2223_v30 = vld [vmem:[%s4817_s14 + $0x58] sm:$0xff]  ;;  %v1836_v33 = vld [vmem:[%s4814_s11] sm:$0x7]  ;;  %v1844_v29 = vsub.s32 1, %v3623_v21 }
 0x19d   : > { %v1737_v3 = vmax.f32 %v1736_v42, 0.0  ;;  %v2039_v42 = vld [vmem:[%s4815_s12 + $0x130] sm:$0x7f] }
 0x19f   : > { %3020 = vmatmul.mubr.msk.f32.vlgmr.msra.gmra.mrb[12].mxu0 %vm1749_vm1, %v1737_v3  ;;  %v2027_v3 = vld [vmem:[%s4815_s12 + $0xd0] sm:$0xff] }
 0x1a0   : > { %3364 = vmatpush1.bf16.msra.mxu0 %v3363_v44  ;;  %1920 = vmatprep.mubr.f32.mxu0 %v3475_v18  ;;  %v2062_v44 = vrot.slane %v2048_v32, %v3660_v38  ;;  %v1840_v32 = vsub.s32 0, %v3623_v21 }
 0x1a1   : > { %3366 = vmatprep.subr.bf16.mxu0 %v3365_v46  ;;  %v3395_v46 = vpack.c.bf16 %v2028_v45, %v2027_v3 }
 0x1a2   : > { %v2229_v41 = vrot.slane %v2224_v40, %v1840_v32 }
 0x1a4   : > { %3368 = vmatpush1.bf16.msra.mxu0 %v3367_v50  ;;  %v2029_v50 = vld [vmem:[%s4815_s12 + $0xe0] sm:$0xff] }
 0x1a5   : > { %3376 = vmatprep.subr.bf16.mxu0 %v3375_v36  ;;  %v3399_v53 = vpack.c.bf16 %v2030_v51, %v2029_v50  ;;  %v2031_v36 = vld [vmem:[%s4815_s12 + $0xf0] sm:$0xff]  ;;  %v2391_v51 = vld [vmem:[%s4806_s3] sm:$0x3f] }
 0x1a6   : > { %v3403_v58 = vpack.c.bf16 %v2032_v56, %v2031_v36 }
 0x272   : > { %v1819_v61 = vpop.f32.mrb[12].mxu0 }
 0x273   : > { %v1820_v59 = vadd.f32 %v2622_v57, %v1819_v61  ;;  %v3021_v1 = vpop.f32.mrb[13].mxu0  ;;  %v3401_v57 = vpack.c.bf16 %v2014_v55, %v2013_v54  ;;  %v2213_v61 = vld [vmem:[%s4817_s14 + $0x8] sm:$0xff] }
 0x274   : > { %v3416_v63 = vpack.c.bf16 %v2216_v62, %v2213_v61  ;;  %v2215_v1 = vld [vmem:[%s4817_s14 + $0x18] sm:$0xff] }
 0x275   : > { %v1823_v7 = vmax.f32 %v1820_v59, 0.0  ;;  %v2212_v59 = vld [vmem:[%s4817_s14] sm:$0xff] }
 0x277   : > { %2624 = vmatmul.mubr.msk.f32.vlgmr.msra.gmra.mrb[14].mxu0 %vm1749_vm1, %v1823_v7  ;;  %3031 = vmatmul.mubr.msk.f32.vlgmr.msra.gmra.mrb[10].mxu1 %vm1749_vm1, %v1823_v7  ;;  %v2218_v7 = vld [vmem:[%s4817_s14 + $0x30] sm:$0xff] }
 0x278   : > { %3378 = vmatpush3.bf16.msra.mxu0 %v3377_v4  ;;  %3409 = vmatpush3.bf16.msra.mxu1 %v3408_v5  ;;  %v3418_v4 = vpack.c.bf16 %v2215_v1, %v2212_v59  ;;  %v2393_v59 = vcombine.high %v2391_v51, %v2391_v51 }
 0x279   : > { %3380 = vmatprep.subr.bf16.mxu0 %v3379_v9  ;;  %3410 = vmatprep.subr.bf16.mxu1 %v3473_v8  ;;  %v2221_v9 = vld [vmem:[%s4817_s14 + $0x48] sm:$0xff] }
 0x27a   : > { %2135 = vmatprep.mubr.f32.mxu0 %v2063_v15  ;;  %3047 = vmatprep.mubr.msk.f32.mxu1 %vm3474_vm5, %v3475_v18  ;;  %v3422_v10 = vpack.c.bf16 %v2221_v9, %v2218_v7  ;;  %v2407_v7 = vrot.slane %v2393_v59, %v3660_v38 }
 0x27c   : > { %3382 = vmatpush3.bf16.msra.mxu0 %v3381_v16  ;;  %3412 = vmatpush3.bf16.msra.mxu1 %v3411_v43 }
 0x27d   : > { %3384 = vmatprep.subr.bf16.mxu0 %v3383_v19  ;;  %3413 = vmatprep.subr.bf16.mxu1 %v3473_v8  ;;  %v2626_v19 = vld [vmem:[%s4816_s13] ss:$0 sm:$0xff] }
 0x280   : > { %3386 = vmatpush3.bf16.msra.mxu0 %v3385_v26  ;;  %3415 = vmatpush3.bf16.msra.mxu1 %v3414_v27  ;;  %v3425_v26 = vpack.c.bf16 %v2217_v24, %v2214_v23 }
 0x281   : > { %3388 = vmatprep.subr.bf16.mxu0 %v3387_v39  ;;  %3045 = vmatprep.subr.mxu1 %v3475_v18  ;;  %v2220_v39 = vld [vmem:[%s4817_s14 + $0x40] sm:$0xff] }
 0x282   : > { %v3428_v31 = vpack.c.bf16 %v2223_v30, %v2220_v39 }
 0x284   : > { %3390 = vmatpush3.bf16.msra.mxu0 %v3389_v34  ;;  %3046 = vmatpush3.msk.msra.mxu1 %vm760_vm11, %v2039_v42  ;;  %v1841_v34 = vrot.slane %v1836_v33, %v1840_v32 }
 0x285   : > { %3392 = vmatprep.subr.bf16.mxu0 %v3391_v37  ;;  %3048 = vmatmul.mubr.msk.f32.vlgmr.msra.gmra.mrb[12].mxu1 %vm757_vm12, %v2062_v44  ;;  %v1845_v37 = vrot.slane %v1836_v33, %v1844_v29  ;;  %v2233_v44 = vrot.slane %v2224_v40, %v1844_v29 }
 0x286   : > { %2308 = vmatprep.mubr.f32.mxu1 %v3475_v18  ;;  %3417 = vmatprep.subr.bf16.mxu1 %v3416_v63 }
 0x287   : > { %3419 = vmatpush1.bf16.msra.mxu1 %v3418_v4 }
 0x288   : > { %3394 = vmatpush3.bf16.msra.mxu0 %v3393_v6 }
 0x289   : > { %3396 = vmatprep.subr.bf16.mxu0 %v3395_v46 }
 0x28c   : > { %3398 = vmatpush3.bf16.msra.mxu0 %v3397_v52 }
 0x28d   : > { %3400 = vmatprep.subr.bf16.mxu0 %v3399_v53  ;;  %v2400_v53 = vrot.slane %v2391_v51, %v3660_v38 }
 0x28f   : > { %v2408_v60 = vcombine.high %v2400_v53, %v2400_v53 }
 0x290   : > { %3402 = vmatpush3.bf16.msra.mxu0 %v3401_v57 }
 0x291   : > { %3404 = vmatprep.subr.bf16.mxu0 %v3403_v58 }
 0x294   : > { %3406 = vmatpush3.bf16.msra.mxu0 %v3405_v35 }
 0x297   : > { %2136 = vmatmul.mubr.f32.vlgmr.msra.gmra.mrb[16].mxu0 %v4618_v0  ;;  %v2219_v0 = vld [vmem:[%s4817_s14 + $0x38] sm:$0xff] }
 0x298   : > { %v3420_v5 = vpack.c.bf16 %v2222_v2, %v2219_v0 }
 0x29a   : > { %3421 = vmatprep.subr.bf16.mxu1 %v3420_v5 }
 0x29b   : > { %3423 = vmatpush1.bf16.msra.mxu1 %v3422_v10 }
 0x29c   : > { %3424 = vmatprep.subr.bf16.mxu1 %v3473_v8 }
 0x34a   : > { %v1922_v11 = vpop.f32.mrb[14].mxu0  ;;  %v1993_v12 = vpop.f32.mrb[10].mxu1 }
 0x34b   : > { %v1924_v13 = vpop.f32.mrb[15].mxu0  ;;  %v3032_v14 = vpop.f32.mrb[11].mxu1 }
 0x34c   : > { %v1925_v42 = vadd.f32 %v1924_v13, %v1845_v37 }
 0x358   : > { %v2207_v15 = vpop.f32.mrb[12].mxu1 }
 0x359   : > { %v3049_v16 = vpop.f32.mrb[13].mxu1 }
 0x36a   : > { %v2944_v17 = vpop.f32.mrb[16].mxu0 }
 0x36b   : > { %v2945_v43 = vpop.f32.mrb[17].mxu0 }
 0x36c   : > { %v2946_v20 = vadd.f32 %v2945_v43, %v2944_v17 }
 0x36e   : > { %v2138_v22 = vadd.f32 %v2946_v20, %v2626_v19 }
 0x370   : > { %v2208_v25 = vadd.f32 %v2207_v15, %v2138_v22 }
 0x372   : > { %v2211_v27 = vmax.f32 %v2208_v25, 0.0 }
 0x374   : > { %2629 = vmatmul.mubr.msk.f32.vlgmr.msra.gmra.mrb[14].mxu1 %vm1749_vm1, %v2211_v27 }
 0x375   : > { %3426 = vmatpush3.bf16.msra.mxu1 %v3425_v26  ;;  %3058 = vmatprep.mubr.msk.f32.mxu1 %vm3474_vm5, %v3475_v18  ;;  %v1923_v18 = vadd.f32 %v1922_v11, %v1841_v34 }
 0x376   : > { %3427 = vmatprep.subr.bf16.mxu1 %v3473_v8  ;;  %v1848_v8 = vsub.s32 2, %v3623_v21  ;;  %v2415_v21 = vld [vmem:[%s4807_s4] sm:$0x3f] }
 0x377   : > { %3453 = vtanh.f32 %v1923_v18  ;;  %v2424_v56 = vrot.slane %v2415_v21, %v3660_v38  ;;  %v2417_v0 = vcombine.high %v2415_v21, %v2415_v21 }
 0x378   : > { %v1849_v46 = vrot.slane %v1836_v33, %v1848_v8  ;;  %3455 = vtanh.f32 %v1925_v42  ;;  %v2237_v49 = vrot.slane %v2224_v40, %v1848_v8 }
 0x379   : > { %3429 = vmatpush3.bf16.msra.mxu1 %v3428_v31  ;;  %v2432_v62 = vcombine.high %v2424_v56, %v2424_v56 }
 0x37a   : > { %v1994_v50 = vadd.f32 %v1993_v12, %v1849_v46  ;;  %v2431_v12 = vrot.slane %v2417_v0, %v3660_v38 }
 0x37c   : > { %3059 = vmatmul.mubr.msk.f32.vlgmr.msra.gmra.mrb[16].mxu1 %vm1749_vm1, %v2211_v27 }
 0x381   : > { %v3454_v36 = vpop.eup %3453 }
 0x382   : > { %v3456_v57 = vpop.eup %3455 }
 0x447   : > { %v2310_v3 = vpop.f32.mrb[14].mxu1 }
 0x448   : > { %v2311_v45 = vadd.f32 %v2310_v3, %v2229_v41  ;;  %v2312_v6 = vpop.f32.mrb[15].mxu1 }
 0x449   : > { %v2313_v47 = vadd.f32 %v2312_v6, %v2233_v44 }
 0x44a   : > { %3457 = vtanh.f32 %v2311_v45 }
 0x44b   : > { %3459 = vtanh.f32 %v2313_v47 }
 0x44c   : > { %3461 = vtanh.f32 %v1994_v50 }
 0x44f   : > { %v2381_v52 = vpop.f32.mrb[16].mxu1 }
 0x450   : > { %v2382_v54 = vadd.f32 %v2381_v52, %v2237_v49  ;;  %v3060_v55 = vpop.f32.mrb[17].mxu1 }
 0x452   : > { %3463 = vtanh.f32 %v2382_v54 }
 0x454   : > { %v3458_v58 = vpop.eup %3457 }
 0x455   : > { %v3460_v28 = vpop.eup %3459  ;;  %v2388_v35 = vadd.f32 %v3458_v58, %v3454_v36 }
 0x456   : > { %v2389_v61 = vadd.f32 %v3460_v28, %v3456_v57  ;;  %v3462_v5 = vpop.eup %3461 }
 0x457   : > { %v2412_v63 = vmax.f32 %v2388_v35, %v2400_v53 }
 0x458   : > { %v2413_v1 = vmax.f32 %v2389_v61, %v2408_v60 }
 0x459   : > { %v2436_v4 = vmin.f32 %v2412_v63, %v2424_v56 }
 0x45a   : > { %v2437_v2 = vmin.f32 %v2413_v1, %v2432_v62 }
 0x45c   : > { %v3464_v9 = vpop.eup %3463  ;;  %v2442_v10 = vcombine.low %v2436_v4, %v2437_v2 }
 0x45d   : > { %v2390_v11 = vadd.f32 %v3464_v9, %v3462_v5 }
 0x45e   : > { %v2449_v15 = vrot.slane %v2442_v10, %v3660_v38 }
 0x45f   : > { %v2414_v13 = vmax.f32 %v2390_v11, %v2407_v7 }
 0x461   : > { %v2438_v14 = vmin.f32 %v2414_v13, %v2431_v12 }
 0x463   : > { %v2456_v16 = vrot.slane %v2438_v14, %v3660_v38 }
 0x465   : > { %v2457_v17 = vcombine.low %v2449_v15, %v2456_v16 }
 0x467   : > { %2464 = vst.msk [vmem:[%s3579_s17] sm:$0x3f] %vm3673_vm10, %v2457_v17  ;;  %2469 = vst.msk [vmem:[#allocation2 + $0xc] sm:$0x3f] %vm3673_vm10, %v2457_v17 }
 0x468   : > { %2470 = vst.msk [vmem:[#allocation3] sm:$0x3f] %vm3673_vm10, %v2457_v17 }
 0x469 PF: > { %s26_s21 = sadd.s32 1, %s3471_s21  }
 0x46a   : > { %p23_p5 = scmp.ge.s32.totalorder %s26_s21, 6  }
 0x46c   :  { %25 = sbr.rel (!%p23_p5) target bundleno = 2 (0x2), region = 122 }

</bundles_post_ra>
